<compile_context>
chip_gen: v5e
topology: v5e:2x2
jax: 0.10.0
libtpu: 0.0.40
codegen_flags: <defaults>
</compile_context>

<pallas_src>
import numpy as np

import jax
import jax.numpy as jnp
from jax import lax
from jax.experimental import pallas as pl
from jax.experimental.pallas import tpu as pltpu


# ----------------------------------------------------------------------------
# Fused Pallas kernel: z = (((x W1 + b1)+ ... ) W6 + b6), ReLU on all but the last
# ----------------------------------------------------------------------------
def _fused_forward_kernel(x_ref, *refs):
    """refs = (w1, b1, w2, b2, ..., w6, b6, out_ref).

    Statically-unrolled chain of 6 matmuls.  Weights/activations are bf16 (MXU),
    accumulation + bias + ReLU are f32 (VPU), output is f32.  All intermediates
    live in vregs; nothing is written back until the final (B, 32) result.
    """
    *wb_refs, o_ref = refs
    n_layers = len(wb_refs) // 2

    a = x_ref[...].astype(jnp.bfloat16)
    for i in range(n_layers):
        w_ref = wb_refs[2 * i]
        b_ref = wb_refs[2 * i + 1]
        acc = jnp.dot(a, w_ref[...], preferred_element_type=jnp.float32)
        acc = acc + b_ref[...]                    # (1, N) bias broadcasts over batch rows
        if i + 1 < n_layers:
            a = jnp.maximum(acc, 0.0).astype(jnp.bfloat16)
        else:
            o_ref[...] = acc.astype(o_ref.dtype)


# ----------------------------------------------------------------------------
# Offline folding: 3x3 stride-2 pad-1 conv  ->  exact dense (Toeplitz) matmul
# ----------------------------------------------------------------------------
def _conv3x3_s2_to_dense(w_hwio, b, h_in, w_in, in_flat_index, k_in):
    """Fold a 3x3 / stride-2 / pad-1 conv into a dense (k_in, Ho*Wo*Cout) matrix.

    Output flat layout: col = (oh*Wo + ow)*Cout + co.  `in_flat_index(h, w, c)` gives the
    flat input column for activation (h, w, c); out-of-range taps are skipped (== zero pad).
    """
    kh, kw, cin, cout = w_hwio.shape
    ho = (h_in + 2 - kh) // 2 + 1
    wo = (w_in + 2 - kw) // 2 + 1
    mat = np.zeros((k_in, ho * wo * cout), np.float32)
    bias = np.zeros((ho * wo * cout,), np.float32)
    for oh in range(ho):
        for ow in range(wo):
            col0 = (oh * wo + ow) * cout
            bias[col0:col0 + cout] = b
            for ki in range(kh):
                h = 2 * oh - 1 + ki
                if h < 0 or h >= h_in:
                    continue
                for kj in range(kw):
                    w_ = 2 * ow - 1 + kj
                    if w_ < 0 or w_ >= w_in:
                        continue
                    for ci in range(cin):
                        mat[in_flat_index(h, w_, ci), col0:col0 + cout] = w_hwio[ki, kj, ci]
    return mat, bias, ho, wo


# ----------------------------------------------------------------------------
# Synthetic backbone parameters (the reference `get_network` is unspecified)
# ----------------------------------------------------------------------------
def init_params(key, c_in=3, widths=(8, 16, 32, 64), proj_hidden=32, proj_out=32):
    keys = jax.random.split(key, 2 * len(widths) + 4)
    chans = (c_in,) + tuple(widths)
    convs = []
    ki = 0
    for li in range(len(widths)):
        cin, cout = chans[li], chans[li + 1]
        w = jax.random.normal(keys[ki], (3, 3, cin, cout), jnp.float32) * (2.0 / (9 * cin)) ** 0.5
        ki += 1
        b = 0.1 * jax.random.normal(keys[ki], (cout,), jnp.float32)
        ki += 1
        convs.append((w, b))
    feat = widths[-1]  # 16x16 input -> 1x1 spatial after 4 stride-2 stages
    w5 = jax.random.normal(keys[ki], (feat, proj_hidden), jnp.float32) * (2.0 / feat) ** 0.5
    ki += 1
    b5 = 0.1 * jax.random.normal(keys[ki], (proj_hidden,), jnp.float32)
    ki += 1
    w6 = jax.random.normal(keys[ki], (proj_hidden, proj_out), jnp.float32) * (1.0 / proj_hidden) ** 0.5
    ki += 1
    b6 = 0.1 * jax.random.normal(keys[ki], (proj_out,), jnp.float32)
    return {"convs": convs, "projector": (w5, b5, w6, b6)}


def fold_params(params, hw=16):
    """Fold the 4 convs (+NCHW transpose) into dense matrices; append projector weights."""
    convs = params["convs"]
    w5, b5, w6, b6 = params["projector"]

    mats, biases = [], []
    cur_h = cur_w = hw
    for li, (w_hwio, b) in enumerate(convs):
        w_np = np.asarray(w_hwio, np.float32)
        b_np = np.asarray(b, np.float32)
        cin = w_np.shape[2]
        if li == 0:
            # layer1 consumes the raw NCHW-flattened image -> transpose folded into rows
            in_idx = lambda h, w, c, H=cur_h, W=cur_w: (c * H + h) * W + w
        else:
            # previous folded layer emits NHWC-flattened activations
            in_idx = lambda h, w, c, W=cur_w, C=cin: (h * W + w) * C + c
        k_in = cur_h * cur_w * cin
        mat, bias, ho, wo = _conv3x3_s2_to_dense(w_np, b_np, cur_h, cur_w, in_idx, k_in)
        mats.append(mat)
        biases.append(bias)
        cur_h, cur_w = ho, wo

    mats += [np.asarray(w5, np.float32), np.asarray(w6, np.float32)]
    biases += [np.asarray(b5, np.float32), np.asarray(b6, np.float32)]
    assert mats[3].shape[1] == mats[4].shape[0], (
        "flattened layer4 features must match projector input (requires %dx%d images)" % (hw, hw))

    weights_bf16 = tuple(jnp.asarray(m, jnp.bfloat16) for m in mats)
    biases_f32 = tuple(jnp.asarray(v.reshape(1, -1), jnp.float32) for v in biases)
    return weights_bf16, biases_f32


# ----------------------------------------------------------------------------
# layer5 forward: one fused, gridless, fully VMEM-resident pallas_call
# ----------------------------------------------------------------------------
@jax.jit
def layer5_forward(folded, x_nchw):
    mats, biases = folded
    batch = x_nchw.shape[0]
    k_in = int(mats[0].shape[0])
    n_out = int(biases[-1].shape[-1])

    xf = x_nchw.reshape(batch, -1).astype(jnp.float32)   # NCHW flatten; transpose is in W1
    assert xf.shape[1] == k_in, "folded weights were built for 16x16 RGB inputs"

    flops = 2 * batch * sum(int(m.shape[0]) * int(m.shape[1]) for m in mats)
    bytes_accessed = (batch * (k_in + n_out) * 4
                      + sum(int(m.size) * 2 for m in mats)
                      + sum(int(v.size) * 4 for v in biases))

    in_specs = [pl.BlockSpec((batch, k_in), lambda: (0, 0))]
    wb_args = []
    for m, v in zip(mats, biases):
        in_specs.append(pl.BlockSpec(tuple(int(d) for d in m.shape), lambda: (0, 0)))
        in_specs.append(pl.BlockSpec(tuple(int(d) for d in v.shape), lambda: (0, 0)))
        wb_args.extend((m, v))

    z = pl.pallas_call(
        _fused_forward_kernel,
        out_shape=jax.ShapeDtypeStruct((batch, n_out), jnp.float32),
        in_specs=in_specs,
        out_specs=pl.BlockSpec((batch, n_out), lambda: (0, 0)),
        compiler_params=pltpu.CompilerParams(vmem_limit_bytes=32 * 1024 * 1024),
        cost_estimate=pl.CostEstimate(flops=flops, transcendentals=0,
                                      bytes_accessed=bytes_accessed),
    )(xf, *wb_args)

    # TODO(synk): `DoubleOutput` is not defined in the reference snippet; modeled here as
    # returning the projection twice (common SSL linear-eval convention).
    return z, z


# ----------------------------------------------------------------------------
# Plain-JAX (XLA) f32 reference of the same synthetic module, for validation
# ----------------------------------------------------------------------------
def reference_forward(params, x_nchw):
    x = x_nchw.astype(jnp.float32)
    for w_hwio, b in params["convs"]:
        x = lax.conv_general_dilated(x, w_hwio, window_strides=(2, 2),
                                     padding=((1, 1), (1, 1)),
                                     dimension_numbers=("NCHW", "HWIO", "NCHW"))
        x = jnp.maximum(x + b.reshape(1, -1, 1, 1), 0.0)
    feat = x.reshape(x.shape[0], -1)
    w5, b5, w6, b6 = params["projector"]
    h = jnp.maximum(feat @ w5 + b5, 0.0)
    return h @ w6 + b6


if __name__ == "__main__":
    key = jax.random.PRNGKey(0)
    pkey, xkey = jax.random.split(key)
    params = init_params(pkey)
    folded = fold_params(params)

    # small deterministic input consistent with the module (RGB images, NCHW like PyTorch)
    x = jax.random.normal(xkey, (2, 3, 16, 16), jnp.float32)

    z1, z2 = layer5_forward(folded, x)
    jax.block_until_ready(z1)
    jax.block_until_ready(z2)
    assert z1.shape == (2, 32) and z2.shape == (2, 32)

    # structural-correctness check (loose tolerance: kernel matmuls run in bf16 w/ f32 acc)
    z_ref = reference_forward(params, x)
    max_err = float(jnp.max(jnp.abs(z1 - z_ref)))
    assert bool(jnp.allclose(z1, z_ref, rtol=1e-1, atol=1e-1)), max_err

    print("KERNEL_OK")
</pallas_src>

<mosaic_0001>
module attributes {stable_mosaic.version = 11 : i64} {
  func.func @_fused_forward_kernel(%arg0: memref<2x768xf32, #tpu.memory_space<vmem>>, %arg1: memref<768x512xbf16, #tpu.memory_space<vmem>>, %arg2: memref<1x512xf32, #tpu.memory_space<vmem>>, %arg3: memref<512x256xbf16, #tpu.memory_space<vmem>>, %arg4: memref<1x256xf32, #tpu.memory_space<vmem>>, %arg5: memref<256x128xbf16, #tpu.memory_space<vmem>>, %arg6: memref<1x128xf32, #tpu.memory_space<vmem>>, %arg7: memref<128x64xbf16, #tpu.memory_space<vmem>>, %arg8: memref<1x64xf32, #tpu.memory_space<vmem>>, %arg9: memref<64x32xbf16, #tpu.memory_space<vmem>>, %arg10: memref<1x32xf32, #tpu.memory_space<vmem>>, %arg11: memref<32x32xbf16, #tpu.memory_space<vmem>>, %arg12: memref<1x32xf32, #tpu.memory_space<vmem>>, %arg13: memref<2x32xf32, #tpu.memory_space<vmem>>) attributes {dimension_semantics = [], scalar_prefetch = 0 : i64, scratch_operands = 0 : i64, tpu.core_type = #tpu.core_type<tc>} {
    %c0 = arith.constant 0 : index
    %c0_0 = arith.constant 0 : index
    %0 = vector.load %arg0[%c0, %c0_0] : memref<2x768xf32, #tpu.memory_space<vmem>>, vector<2x768xf32>
    %1 = arith.truncf %0 : vector<2x768xf32> to vector<2x768xbf16>
    %c0_1 = arith.constant 0 : index
    %c0_2 = arith.constant 0 : index
    %2 = vector.load %arg1[%c0_1, %c0_2] : memref<768x512xbf16, #tpu.memory_space<vmem>>, vector<768x512xbf16>
    %cst = arith.constant dense<0.000000e+00> : vector<2x512xf32>
    %3 = tpu.matmul %1, %2, %cst {dimension_numbers = #tpu.dot_dimension_numbers<[1], [0], [0], [1], [0, 0, 1, 1], [], []>} : vector<2x768xbf16>, vector<768x512xbf16>, vector<2x512xf32> -> vector<2x512xf32>
    %c0_3 = arith.constant 0 : index
    %c0_4 = arith.constant 0 : index
    %4 = vector.load %arg2[%c0_3, %c0_4] : memref<1x512xf32, #tpu.memory_space<vmem>>, vector<1x512xf32>
    %5 = vector.broadcast %4 : vector<1x512xf32> to vector<2x512xf32>
    %6 = arith.addf %3, %5 : vector<2x512xf32>
    %cst_5 = arith.constant 0.000000e+00 : f32
    %7 = vector.broadcast %cst_5 : f32 to vector<2x512xf32>
    %8 = arith.maximumf %6, %7 : vector<2x512xf32>
    %9 = arith.truncf %8 : vector<2x512xf32> to vector<2x512xbf16>
    %c0_6 = arith.constant 0 : index
    %c0_7 = arith.constant 0 : index
    %10 = vector.load %arg3[%c0_6, %c0_7] : memref<512x256xbf16, #tpu.memory_space<vmem>>, vector<512x256xbf16>
    %cst_8 = arith.constant dense<0.000000e+00> : vector<2x256xf32>
    %11 = tpu.matmul %9, %10, %cst_8 {dimension_numbers = #tpu.dot_dimension_numbers<[1], [0], [0], [1], [0, 0, 1, 1], [], []>} : vector<2x512xbf16>, vector<512x256xbf16>, vector<2x256xf32> -> vector<2x256xf32>
    %c0_9 = arith.constant 0 : index
    %c0_10 = arith.constant 0 : index
    %12 = vector.load %arg4[%c0_9, %c0_10] : memref<1x256xf32, #tpu.memory_space<vmem>>, vector<1x256xf32>
    %13 = vector.broadcast %12 : vector<1x256xf32> to vector<2x256xf32>
    %14 = arith.addf %11, %13 : vector<2x256xf32>
    %cst_11 = arith.constant 0.000000e+00 : f32
    %15 = vector.broadcast %cst_11 : f32 to vector<2x256xf32>
    %16 = arith.maximumf %14, %15 : vector<2x256xf32>
    %17 = arith.truncf %16 : vector<2x256xf32> to vector<2x256xbf16>
    %c0_12 = arith.constant 0 : index
    %c0_13 = arith.constant 0 : index
    %18 = vector.load %arg5[%c0_12, %c0_13] : memref<256x128xbf16, #tpu.memory_space<vmem>>, vector<256x128xbf16>
    %cst_14 = arith.constant dense<0.000000e+00> : vector<2x128xf32>
    %19 = tpu.matmul %17, %18, %cst_14 {dimension_numbers = #tpu.dot_dimension_numbers<[1], [0], [0], [1], [0, 0, 1, 1], [], []>} : vector<2x256xbf16>, vector<256x128xbf16>, vector<2x128xf32> -> vector<2x128xf32>
    %c0_15 = arith.constant 0 : index
    %c0_16 = arith.constant 0 : index
    %20 = vector.load %arg6[%c0_15, %c0_16] : memref<1x128xf32, #tpu.memory_space<vmem>>, vector<1x128xf32>
    %21 = vector.broadcast %20 : vector<1x128xf32> to vector<2x128xf32>
    %22 = arith.addf %19, %21 : vector<2x128xf32>
    %cst_17 = arith.constant 0.000000e+00 : f32
    %23 = vector.broadcast %cst_17 : f32 to vector<2x128xf32>
    %24 = arith.maximumf %22, %23 : vector<2x128xf32>
    %25 = arith.truncf %24 : vector<2x128xf32> to vector<2x128xbf16>
    %c0_18 = arith.constant 0 : index
    %c0_19 = arith.constant 0 : index
    %26 = vector.load %arg7[%c0_18, %c0_19] : memref<128x64xbf16, #tpu.memory_space<vmem>>, vector<128x64xbf16>
    %cst_20 = arith.constant dense<0.000000e+00> : vector<2x64xf32>
    %27 = tpu.matmul %25, %26, %cst_20 {dimension_numbers = #tpu.dot_dimension_numbers<[1], [0], [0], [1], [0, 0, 1, 1], [], []>} : vector<2x128xbf16>, vector<128x64xbf16>, vector<2x64xf32> -> vector<2x64xf32>
    %c0_21 = arith.constant 0 : index
    %c0_22 = arith.constant 0 : index
    %28 = vector.load %arg8[%c0_21, %c0_22] : memref<1x64xf32, #tpu.memory_space<vmem>>, vector<1x64xf32>
    %29 = vector.broadcast %28 : vector<1x64xf32> to vector<2x64xf32>
    %30 = arith.addf %27, %29 : vector<2x64xf32>
    %cst_23 = arith.constant 0.000000e+00 : f32
    %31 = vector.broadcast %cst_23 : f32 to vector<2x64xf32>
    %32 = arith.maximumf %30, %31 : vector<2x64xf32>
    %33 = arith.truncf %32 : vector<2x64xf32> to vector<2x64xbf16>
    %c0_24 = arith.constant 0 : index
    %c0_25 = arith.constant 0 : index
    %34 = vector.load %arg9[%c0_24, %c0_25] : memref<64x32xbf16, #tpu.memory_space<vmem>>, vector<64x32xbf16>
    %cst_26 = arith.constant dense<0.000000e+00> : vector<2x32xf32>
    %35 = tpu.matmul %33, %34, %cst_26 {dimension_numbers = #tpu.dot_dimension_numbers<[1], [0], [0], [1], [0, 0, 1, 1], [], []>} : vector<2x64xbf16>, vector<64x32xbf16>, vector<2x32xf32> -> vector<2x32xf32>
    %c0_27 = arith.constant 0 : index
    %c0_28 = arith.constant 0 : index
    %36 = vector.load %arg10[%c0_27, %c0_28] : memref<1x32xf32, #tpu.memory_space<vmem>>, vector<1x32xf32>
    %37 = vector.broadcast %36 : vector<1x32xf32> to vector<2x32xf32>
    %38 = arith.addf %35, %37 : vector<2x32xf32>
    %cst_29 = arith.constant 0.000000e+00 : f32
    %39 = vector.broadcast %cst_29 : f32 to vector<2x32xf32>
    %40 = arith.maximumf %38, %39 : vector<2x32xf32>
    %41 = arith.truncf %40 : vector<2x32xf32> to vector<2x32xbf16>
    %c0_30 = arith.constant 0 : index
    %c0_31 = arith.constant 0 : index
    %42 = vector.load %arg11[%c0_30, %c0_31] : memref<32x32xbf16, #tpu.memory_space<vmem>>, vector<32x32xbf16>
    %cst_32 = arith.constant dense<0.000000e+00> : vector<2x32xf32>
    %43 = tpu.matmul %41, %42, %cst_32 {dimension_numbers = #tpu.dot_dimension_numbers<[1], [0], [0], [1], [0, 0, 1, 1], [], []>} : vector<2x32xbf16>, vector<32x32xbf16>, vector<2x32xf32> -> vector<2x32xf32>
    %c0_33 = arith.constant 0 : index
    %c0_34 = arith.constant 0 : index
    %44 = vector.load %arg12[%c0_33, %c0_34] : memref<1x32xf32, #tpu.memory_space<vmem>>, vector<1x32xf32>
    %45 = vector.broadcast %44 : vector<1x32xf32> to vector<2x32xf32>
    %46 = arith.addf %43, %45 : vector<2x32xf32>
    %c0_35 = arith.constant 0 : index
    %c0_36 = arith.constant 0 : index
    %47 = vector.load %arg13[%c0_35, %c0_36] : memref<2x32xf32, #tpu.memory_space<vmem>>, vector<2x32xf32>
    tpu.vector_store %arg13[%c0_35, %c0_36], %46 {strides = array<i32>} : memref<2x32xf32, #tpu.memory_space<vmem>>, vector<2x32xf32>,
    return
  }
}

</mosaic_0001>

<bundles_post_ra>
// kernel: layer5_forward.1
= control target key start
LH: loop header
LB: loop body
LE: loop exit
PB: predicated region body
PF: predicated region fallthrough
CT: control target
= control target key end

     0   :  { %18 = vsyncpa [#allocation3], 0  ;;  %s4167_s0 = inlined_call_operand.vmem [shape: f32[2,768], index: 0, kind: input, shape index: {}]   ;;  %s4168_s1 = inlined_call_operand.hbm [shape: bf16[768,512], index: 1, kind: input, shape index: {}]   ;;  %s4169_s2 = inlined_call_operand.vmem [shape: f32[1,512], index: 2, kind: input, shape index: {}]   ;;  %s4170_s3 = inlined_call_operand.hbm [shape: bf16[512,256], index: 3, kind: input, shape index: {}]   ;;  %s4171_s4 = inlined_call_operand.vmem [shape: f32[1,256], index: 4, kind: input, shape index: {}]   ;;  %s4172_s5 = inlined_call_operand.vmem [shape: bf16[256,128], index: 5, kind: input, shape index: {}]   ;;  %s4173_s6 = inlined_call_operand.vmem [shape: f32[1,128], index: 6, kind: input, shape index: {}]   ;;  %s4174_s7 = inlined_call_operand.vmem [shape: bf16[128,64], index: 7, kind: input, shape index: {}]   ;;  %s4175_s8 = inlined_call_operand.vmem [shape: f32[1,64], index: 8, kind: input, shape index: {}]   ;;  %s4176_s9 = inlined_call_operand.vmem [shape: bf16[64,32], index: 9, kind: input, shape index: {}]   ;;  %s4177_s10 = inlined_call_operand.vmem [shape: f32[1,32], index: 10, kind: input, shape index: {}]   ;;  %s4178_s11 = inlined_call_operand.vmem [shape: bf16[32,32], index: 11, kind: input, shape index: {}]   ;;  %s4179_s12 = inlined_call_operand.vmem [shape: f32[1,32], index: 12, kind: input, shape index: {}]   ;;  %s4180_s13 = inlined_call_operand.vmem [shape: f32[2,32], index: 13, kind: output, shape index: {}]  }
   0x1   :  { %s26_s27 = sshll.u32 %s4168_s1, 4  ;;  %s27_s27 = int_to_ptr.hbm [resolvable:$true] %s26_s27 }
   0x2   :  { %19 = vsyncpa [#allocation5], 0  ;;  %s3919_s28 = smov [#allocation2]   ;;  %s41_s15 = sshll.u32 %s4170_s3, 4  ;;  %s42_s15 = int_to_ptr.hbm [resolvable:$true] %s41_s15 }
   0x3   :  { %s28_s29 = sshll.u32 %s3919_s28, 4  ;;  %s3920_s16 = smov 256   ;;  %s29_s29 = int_to_ptr.vmem [resolvable:$true] %s28_s29 }
   0x4   :  { %s3921_s17 = smov 16   ;;  %s3922_s18 = smov [#allocation4]  }
   0x5   :  { %34 = dma.hbm_to_vmem [thread:$0]  %s27_s27, 24576, %s29_s29, [#allocation3], %s3920_s16, %s3920_s16, %s3921_s17  }
   0x6   :  { %s43_s19 = sshll.u32 %s3922_s18, 4  ;;  %s3923_s20 = smov 128   ;;  %s44_s19 = int_to_ptr.vmem [resolvable:$true] %s43_s19 }
   0x7   :  { %s3924_s21 = smov 8  }
   0x8   :  { %49 = dma.hbm_to_vmem [thread:$0]  %s42_s15, 8192, %s44_s19, [#allocation5], %s3923_s20, %s3923_s20, %s3924_s21  }
   0x9   :  { %3915 = dma.done.wait [#allocation3], 24576  }
   0xa   :  { %3916 = vsyncadd [#allocation3], 4294942720 }
   0xb   :  { %3917 = dma.done.wait [#allocation5], 8192  }
   0xc   :  { %3918 = vsyncadd [#allocation5], 4294959104  ;;  %v2539_v0 = vld [vmem:[#allocation2 + $0xe0] sm:$0xf]  ;;  %v3601_v1 = vld [vmem:[#allocation2 + $0xec] sm:$0xf0] }
   0xd   :  { %v2667_v2 = vld [vmem:[#allocation2 + $0x1e0] sm:$0xf]  ;;  %v2540_v3 = vor.u32 %v3601_v1, %v2539_v0  ;;  %v3633_v4 = vld [vmem:[#allocation2 + $0x1ec] sm:$0xf0]  ;;  %vm2361_vm0 = vcmask 523264   ;;  %vm2400_vm1 = vcmask 261120  }
   0xe   :  { %v2795_v5 = vld [vmem:[#allocation2 + $0x2e0] sm:$0xf]  ;;  %v3665_v6 = vld [vmem:[#allocation2 + $0x2ec] sm:$0xf0]  ;;  %v2668_v7 = vor.u32 %v3633_v4, %v2667_v2  ;;  %vm2417_vm2 = vcmask 254976  }
   0xf   :  { %v2796_v8 = vor.u32 %v3665_v6, %v2795_v5  ;;  %v2923_v9 = vld [vmem:[#allocation2 + $0x3e0] sm:$0xf]  ;;  %v3697_v10 = vld [vmem:[#allocation2 + $0x3ec] sm:$0xf0]  ;;  %1264 = vmatpush.bf16.msra.mxu0 %v2540_v3 }
  0x10   :  { %v2523_v11 = vld [vmem:[#allocation2 + $0xc0] sm:$0xf]  ;;  %v2924_v12 = vor.u32 %v3697_v10, %v2923_v9  ;;  %v3597_v13 = vld [vmem:[#allocation2 + $0xcc] sm:$0xf0]  ;;  %1277 = vmatpush.bf16.msra.mxu1 %v2668_v7 }
  0x11   :  { %v2651_v14 = vld [vmem:[#allocation2 + $0x1c0] sm:$0xf]  ;;  %v3629_v15 = vld [vmem:[#allocation2 + $0x1cc] sm:$0xf0]  ;;  %1290 = vmatpush.bf16.msra.mxu2 %v2796_v8  ;;  %v2524_v16 = vor.u32 %v3597_v13, %v2523_v11 }
  0x12   :  { %v2652_v17 = vor.u32 %v3629_v15, %v2651_v14  ;;  %v2779_v18 = vld [vmem:[#allocation2 + $0x2c0] sm:$0xf]  ;;  %v3661_v19 = vld [vmem:[#allocation2 + $0x2cc] sm:$0xf0]  ;;  %1303 = vmatpush.bf16.msra.mxu3 %v2924_v12 }
  0x13   :  { %v2907_v20 = vld [vmem:[#allocation2 + $0x3c0] sm:$0xf]  ;;  %v2780_v21 = vor.u32 %v3661_v19, %v2779_v18  ;;  %v3693_v22 = vld [vmem:[#allocation2 + $0x3cc] sm:$0xf0]  ;;  %1265 = vmatpush.bf16.msra.mxu0 %v2524_v16 }
  0x14   :  { %v2507_v23 = vld [vmem:[#allocation2 + $0xa0] sm:$0xf]  ;;  %v3593_v24 = vld [vmem:[#allocation2 + $0xac] sm:$0xf0]  ;;  %v2908_v25 = vor.u32 %v3693_v22, %v2907_v20  ;;  %1278 = vmatpush.bf16.msra.mxu1 %v2652_v17 }
  0x15   :  { %v2635_v26 = vld [vmem:[#allocation2 + $0x1a0] sm:$0xf]  ;;  %v3625_v27 = vld [vmem:[#allocation2 + $0x1ac] sm:$0xf0]  ;;  %v2508_v29 = vor.u32 %v3593_v24, %v2507_v23  ;;  %1291 = vmatpush.bf16.msra.mxu2 %v2780_v21 }
  0x16   :  { %v2763_v28 = vld [vmem:[#allocation2 + $0x2a0] sm:$0xf]  ;;  %v3657_v30 = vld [vmem:[#allocation2 + $0x2ac] sm:$0xf0]  ;;  %v2636_v33 = vor.u32 %v3625_v27, %v2635_v26  ;;  %1304 = vmatpush.bf16.msra.mxu3 %v2908_v25 }
  0x17   :  { %v2891_v31 = vld [vmem:[#allocation2 + $0x3a0] sm:$0xf]  ;;  %v3689_v32 = vld [vmem:[#allocation2 + $0x3ac] sm:$0xf0]  ;;  %v2764_v34 = vor.u32 %v3657_v30, %v2763_v28  ;;  %1266 = vmatpush.bf16.msra.mxu0 %v2508_v29 }
  0x18   :  { %v2491_v35 = vld [vmem:[#allocation2 + $0x80] sm:$0xf]  ;;  %v3589_v36 = vld [vmem:[#allocation2 + $0x8c] sm:$0xf0]  ;;  %v2892_v38 = vor.u32 %v3689_v32, %v2891_v31  ;;  %1279 = vmatpush.bf16.msra.mxu1 %v2636_v33  ;;  %v3599_v33 = vld [vmem:[#allocation2 + $0xe4] sm:$0xf] }
  0x19   :  { %v2619_v37 = vld [vmem:[#allocation2 + $0x180] sm:$0xf]  ;;  %v3621_v39 = vld [vmem:[#allocation2 + $0x18c] sm:$0xf0]  ;;  %v2492_v44 = vor.u32 %v3589_v36, %v2491_v35  ;;  %1292 = vmatpush.bf16.msra.mxu2 %v2764_v34  ;;  %v2541_v34 = vld [vmem:[#allocation2 + $0xf0] sm:$0xf0] }
  0x1a   :  { %v2747_v40 = vld [vmem:[#allocation2 + $0x280] sm:$0xf]  ;;  %v3653_v41 = vld [vmem:[#allocation2 + $0x28c] sm:$0xf0]  ;;  %v2620_v45 = vor.u32 %v3621_v39, %v2619_v37  ;;  %1305 = vmatpush.bf16.msra.mxu3 %v2892_v38  ;;  %v3631_v37 = vld [vmem:[#allocation2 + $0x1e4] sm:$0xf] }
  0x1b   :  { %v2875_v42 = vld [vmem:[#allocation2 + $0x380] sm:$0xf]  ;;  %v3685_v43 = vld [vmem:[#allocation2 + $0x38c] sm:$0xf0]  ;;  %v2748_v46 = vor.u32 %v3653_v41, %v2747_v40  ;;  %1267 = vmatpush.bf16.msra.mxu0 %v2492_v44  ;;  %v2669_v38 = vld [vmem:[#allocation2 + $0x1f0] sm:$0xf0] }
  0x1c   :  { %v2475_v47 = vld [vmem:[#allocation2 + $0x60] sm:$0xf]  ;;  %v3585_v48 = vld [vmem:[#allocation2 + $0x6c] sm:$0xf0]  ;;  %v2876_v50 = vor.u32 %v3685_v43, %v2875_v42  ;;  %1280 = vmatpush.bf16.msra.mxu1 %v2620_v45  ;;  %v2544_v42 = vor.u32 %v3599_v33, %v2541_v34 }
  0x1d   :  { %v2603_v49 = vld [vmem:[#allocation2 + $0x160] sm:$0xf]  ;;  %v3617_v51 = vld [vmem:[#allocation2 + $0x16c] sm:$0xf0]  ;;  %v2476_v56 = vor.u32 %v3585_v48, %v2475_v47  ;;  %1293 = vmatpush.bf16.msra.mxu2 %v2748_v46  ;;  %v2672_v46 = vor.u32 %v3631_v37, %v2669_v38  ;;  %v3595_v48 = vld [vmem:[#allocation2 + $0xc4] sm:$0xf] }
  0x1e   :  { %v2731_v52 = vld [vmem:[#allocation2 + $0x260] sm:$0xf]  ;;  %v3649_v53 = vld [vmem:[#allocation2 + $0x26c] sm:$0xf0]  ;;  %v2604_v57 = vor.u32 %v3617_v51, %v2603_v49  ;;  %1306 = vmatpush.bf16.msra.mxu3 %v2876_v50  ;;  %v2525_v49 = vld [vmem:[#allocation2 + $0xd0] sm:$0xf0] }
  0x1f   :  { %v2859_v54 = vld [vmem:[#allocation2 + $0x360] sm:$0xf]  ;;  %v3681_v55 = vld [vmem:[#allocation2 + $0x36c] sm:$0xf0]  ;;  %v2732_v58 = vor.u32 %v3649_v53, %v2731_v52  ;;  %1268 = vmatpush.bf16.msra.mxu0 %v2476_v56  ;;  %v3627_v50 = vld [vmem:[#allocation2 + $0x1c4] sm:$0xf] }
  0x20   :  { %v2459_v59 = vld [vmem:[#allocation2 + $0x40] sm:$0xf]  ;;  %v3581_v60 = vld [vmem:[#allocation2 + $0x4c] sm:$0xf0]  ;;  %v2860_v62 = vor.u32 %v3681_v55, %v2859_v54  ;;  %1281 = vmatpush.bf16.msra.mxu1 %v2604_v57  ;;  %v2653_v51 = vld [vmem:[#allocation2 + $0x1d0] sm:$0xf0]  ;;  %v2528_v54 = vor.u32 %v3595_v48, %v2525_v49 }
  0x21   :  { %v2587_v61 = vld [vmem:[#allocation2 + $0x140] sm:$0xf]  ;;  %v3613_v63 = vld [vmem:[#allocation2 + $0x14c] sm:$0xf0]  ;;  %v2460_v4 = vor.u32 %v3581_v60, %v2459_v59  ;;  %1294 = vmatpush.bf16.msra.mxu2 %v2732_v58  ;;  %v2656_v58 = vor.u32 %v3627_v50, %v2653_v51  ;;  %v3591_v60 = vld [vmem:[#allocation2 + $0xa4] sm:$0xf] }
  0x22   :  { %v2715_v0 = vld [vmem:[#allocation2 + $0x240] sm:$0xf]  ;;  %v3645_v1 = vld [vmem:[#allocation2 + $0x24c] sm:$0xf0]  ;;  %v2588_v5 = vor.u32 %v3613_v63, %v2587_v61  ;;  %1307 = vmatpush.bf16.msra.mxu3 %v2860_v62  ;;  %v2509_v61 = vld [vmem:[#allocation2 + $0xb0] sm:$0xf0] }
  0x23   :  { %v2843_v2 = vld [vmem:[#allocation2 + $0x340] sm:$0xf]  ;;  %v3677_v3 = vld [vmem:[#allocation2 + $0x34c] sm:$0xf0]  ;;  %v2716_v6 = vor.u32 %v3645_v1, %v2715_v0  ;;  %1269 = vmatpush.bf16.msra.mxu0 %v2460_v4  ;;  %v3623_v62 = vld [vmem:[#allocation2 + $0x1a4] sm:$0xf]  ;;  %v2512_v4 = vor.u32 %v3591_v60, %v2509_v61 }
  0x24   :  { %v2443_v7 = vld [vmem:[#allocation2 + $0x20] sm:$0xf]  ;;  %v3577_v8 = vld [vmem:[#allocation2 + $0x2c] sm:$0xf0]  ;;  %v2844_v10 = vor.u32 %v3677_v3, %v2843_v2  ;;  %1282 = vmatpush.bf16.msra.mxu1 %v2588_v5  ;;  %v2637_v63 = vld [vmem:[#allocation2 + $0x1b0] sm:$0xf0] }
  0x25   :  { %v2571_v9 = vld [vmem:[#allocation2 + $0x120] sm:$0xf]  ;;  %v3609_v11 = vld [vmem:[#allocation2 + $0x12c] sm:$0xf0]  ;;  %v2444_v16 = vor.u32 %v3577_v8, %v2443_v7  ;;  %1295 = vmatpush.bf16.msra.mxu2 %v2716_v6  ;;  %v77_v2 = vld [vmem:[%s4167_s0] sm:$0xff]  ;;  %v2640_v7 = vor.u32 %v3623_v62, %v2637_v63 }
  0x26   :  { %v2699_v12 = vld [vmem:[#allocation2 + $0x220] sm:$0xf]  ;;  %v3641_v13 = vld [vmem:[#allocation2 + $0x22c] sm:$0xf0]  ;;  %v2572_v19 = vor.u32 %v3609_v11, %v2571_v9  ;;  %1308 = vmatpush.bf16.msra.mxu3 %v2844_v10  ;;  %81 = vst [vmem:[#allocation1] ss:$4 sm:$0xff] %v77_v2 }
  0x27   :  { %v2827_v14 = vld [vmem:[#allocation2 + $0x320] sm:$0xf]  ;;  %v3673_v15 = vld [vmem:[#allocation2 + $0x32c] sm:$0xf0]  ;;  %v2700_v20 = vor.u32 %v3641_v13, %v2699_v12  ;;  %1270 = vmatpush.bf16.msra.mxu0 %v2444_v16  ;;  %v3587_v9 = vld [vmem:[#allocation2 + $0x84] sm:$0xf] }
  0x28   :  { %v2427_v17 = vld [vmem:[#allocation2] sm:$0xf]  ;;  %v3573_v18 = vld [vmem:[#allocation2 + $0xc] sm:$0xf0]  ;;  %v2828_v24 = vor.u32 %v3673_v15, %v2827_v14  ;;  %1283 = vmatpush.bf16.msra.mxu1 %v2572_v19  ;;  %v2493_v10 = vld [vmem:[#allocation2 + $0x90] sm:$0xf0] }
  0x29   :  { %v2555_v21 = vld [vmem:[#allocation2 + $0x100] sm:$0xf]  ;;  %v3605_v22 = vld [vmem:[#allocation2 + $0x10c] sm:$0xf0]  ;;  %v2428_v31 = vor.u32 %v3573_v18, %v2427_v17  ;;  %1296 = vmatpush.bf16.msra.mxu2 %v2700_v20  ;;  %v3619_v11 = vld [vmem:[#allocation2 + $0x184] sm:$0xf]  ;;  %v2496_v16 = vor.u32 %v3587_v9, %v2493_v10 }
  0x2a   :  { %v2683_v23 = vld [vmem:[#allocation2 + $0x200] sm:$0xf]  ;;  %v3637_v25 = vld [vmem:[#allocation2 + $0x20c] sm:$0xf0]  ;;  %v2556_v35 = vor.u32 %v3605_v22, %v2555_v21  ;;  %1309 = vmatpush.bf16.msra.mxu3 %v2828_v24  ;;  %v2621_v12 = vld [vmem:[#allocation2 + $0x190] sm:$0xf0] }
  0x2b   :  { %v2811_v26 = vld [vmem:[#allocation2 + $0x300] sm:$0xf]  ;;  %v3669_v27 = vld [vmem:[#allocation2 + $0x30c] sm:$0xf0]  ;;  %v2684_v36 = vor.u32 %v3637_v25, %v2683_v23  ;;  %1271 = vmatpush.bf16.msra.mxu0 %v2428_v31  ;;  %v2624_v20 = vor.u32 %v3619_v11, %v2621_v12  ;;  %v3583_v21 = vld [vmem:[#allocation2 + $0x64] sm:$0xf] }
  0x2c   :  { %v3051_v28 = vld [vmem:[#allocation2 + $0x4e0] sm:$0xf]  ;;  %v3729_v29 = vld [vmem:[#allocation2 + $0x4ec] sm:$0xf0]  ;;  %v2812_v39 = vor.u32 %v3669_v27, %v2811_v26  ;;  %1284 = vmatpush.bf16.msra.mxu1 %v2556_v35  ;;  %v2477_v22 = vld [vmem:[#allocation2 + $0x70] sm:$0xf0] }
  0x2d   :  { %v3179_v30 = vld [vmem:[#allocation2 + $0x5e0] sm:$0xf]  ;;  %v3761_v32 = vld [vmem:[#allocation2 + $0x5ec] sm:$0xf0]  ;;  %v3052_v40 = vor.u32 %v3729_v29, %v3051_v28  ;;  %1297 = vmatpush.bf16.msra.mxu2 %v2684_v36  ;;  %v3615_v23 = vld [vmem:[#allocation2 + $0x164] sm:$0xf] }
  0x2e   :  { %v3180_v41 = vor.u32 %v3761_v32, %v3179_v30  ;;  %v3035_v43 = vld [vmem:[#allocation2 + $0x4c0] sm:$0xf]  ;;  %v3725_v44 = vld [vmem:[#allocation2 + $0x4cc] sm:$0xf0]  ;;  %1310 = vmatpush.bf16.msra.mxu3 %v2812_v39  ;;  %v2605_v24 = vld [vmem:[#allocation2 + $0x170] sm:$0xf0]  ;;  %v2480_v32 = vor.u32 %v3583_v21, %v2477_v22 }
  0x2f   :  { %v3163_v45 = vld [vmem:[#allocation2 + $0x5c0] sm:$0xf]  ;;  %v3757_v47 = vld [vmem:[#allocation2 + $0x5cc] sm:$0xf0]  ;;  %1316 = vmatpush.bf16.msrb.mxu0 %v3052_v40  ;;  %v3036_v52 = vor.u32 %v3725_v44, %v3035_v43  ;;  %v2608_v37 = vor.u32 %v3615_v23, %v2605_v24  ;;  %v3579_v39 = vld [vmem:[#allocation2 + $0x44] sm:$0xf] }
  0x30   :  { %1329 = vmatpush.bf16.msrb.mxu1 %v3180_v41  ;;  %v3164_v53 = vor.u32 %v3757_v47, %v3163_v45  ;;  %v3019_v55 = vld [vmem:[#allocation2 + $0x4a0] sm:$0xf]  ;;  %v3721_v56 = vld [vmem:[#allocation2 + $0x4ac] sm:$0xf0]  ;;  %v2461_v40 = vld [vmem:[#allocation2 + $0x50] sm:$0xf0] }
  0x31   :  { %1342 = vmatpush.bf16.msrb.mxu2 %v2544_v42  ;;  %v3147_v57 = vld [vmem:[#allocation2 + $0x5a0] sm:$0xf]  ;;  %v3753_v59 = vld [vmem:[#allocation2 + $0x5ac] sm:$0xf0]  ;;  %v3020_v0 = vor.u32 %v3721_v56, %v3019_v55  ;;  %v3611_v43 = vld [vmem:[#allocation2 + $0x144] sm:$0xf]  ;;  %v2464_v47 = vor.u32 %v3579_v39, %v2461_v40 }
  0x32   :  { %1355 = vmatpush.bf16.msrb.mxu3 %v2672_v46  ;;  %v3003_v1 = vld [vmem:[#allocation2 + $0x480] sm:$0xf]  ;;  %v3148_v3 = vor.u32 %v3753_v59, %v3147_v57  ;;  %v3717_v5 = vld [vmem:[#allocation2 + $0x48c] sm:$0xf0]  ;;  %v2589_v44 = vld [vmem:[#allocation2 + $0x150] sm:$0xf0] }
  0x33   :  { %1317 = vmatpush.bf16.msrb.mxu0 %v3036_v52  ;;  %v3131_v6 = vld [vmem:[#allocation2 + $0x580] sm:$0xf]  ;;  %v3749_v8 = vld [vmem:[#allocation2 + $0x58c] sm:$0xf0]  ;;  %v3004_v13 = vor.u32 %v3717_v5, %v3003_v1  ;;  %v2592_v51 = vor.u32 %v3611_v43, %v2589_v44  ;;  %v3607_v55 = vld [vmem:[#allocation2 + $0x124] sm:$0xf] }
  0x34   :  { %1330 = vmatpush.bf16.msrb.mxu1 %v3164_v53  ;;  %v2987_v14 = vld [vmem:[#allocation2 + $0x460] sm:$0xf]  ;;  %v3132_v15 = vor.u32 %v3749_v8, %v3131_v6  ;;  %v3713_v17 = vld [vmem:[#allocation2 + $0x46c] sm:$0xf0]  ;;  %v3575_v53 = vld [vmem:[#allocation2 + $0x24] sm:$0xf] }
  0x35   :  { %1343 = vmatpush.bf16.msrb.mxu2 %v2528_v54  ;;  %v3115_v18 = vld [vmem:[#allocation2 + $0x560] sm:$0xf]  ;;  %v3745_v19 = vld [vmem:[#allocation2 + $0x56c] sm:$0xf0]  ;;  %v2988_v27 = vor.u32 %v3713_v17, %v2987_v14  ;;  %v2445_v54 = vld [vmem:[#allocation2 + $0x30] sm:$0xf0] }
  0x36   :  { %1356 = vmatpush.bf16.msrb.mxu3 %v2656_v58  ;;  %v2971_v25 = vld [vmem:[#allocation2 + $0x440] sm:$0xf]  ;;  %v3709_v26 = vld [vmem:[#allocation2 + $0x44c] sm:$0xf0]  ;;  %v3116_v28 = vor.u32 %v3745_v19, %v3115_v18  ;;  %v2573_v56 = vld [vmem:[#allocation2 + $0x130] sm:$0xf0]  ;;  %v2448_v63 = vor.u32 %v3575_v53, %v2445_v54 }
  0x37   :  { %1318 = vmatpush.bf16.msrb.mxu0 %v3020_v0  ;;  %v3099_v29 = vld [vmem:[#allocation2 + $0x540] sm:$0xf]  ;;  %v86_v30 = vld.sshfl [vmem:[#allocation1 + $0x10] sm:$0xff pattern:$0x73625140]  ;;  %v2972_v45 = vor.u32 %v3709_v26, %v2971_v25  ;;  %v2576_v2 = vor.u32 %v3607_v55, %v2573_v56 }
  0x38   :  { %1331 = vmatpush.bf16.msrb.mxu1 %v3148_v3  ;;  %v84_v31 = vld.sshfl [vmem:[#allocation1] sm:$0xff pattern:$0x73625140]  ;;  %v4004_v33 = vpack.c.bf16 %v86_v30, %v86_v30  ;;  %v87_v35 = vld.sshfl [vmem:[#allocation1 + $0x18] sm:$0xff pattern:$0x73625140] }
  0x39   :  { %1344 = vmatpush.bf16.msrb.mxu2 %v2512_v4  ;;  %v4006_v34 = vpack.c.bf16 %v84_v31, %v84_v31  ;;  %v85_v36 = vld.sshfl [vmem:[#allocation1 + $0x8] sm:$0xff pattern:$0x73625140]  ;;  %v3741_v38 = vld [vmem:[#allocation2 + $0x54c] sm:$0xf0]  ;;  %v4008_v41 = vpack.c.bf16 %v87_v35, %v87_v35 }
  0x3a   :  { %1357 = vmatpush.bf16.msrb.mxu3 %v2640_v7  ;;  %v4010_v42 = vpack.c.bf16 %v85_v36, %v85_v36  ;;  %1298 = vmatmul.bf16.vlgmr.msra.gmra.mxu2 %v4004_v33  ;;  %v3100_v46 = vor.u32 %v3741_v38, %v3099_v29  ;;  %v2955_v48 = vld [vmem:[#allocation2 + $0x420] sm:$0xf]  ;;  %v3705_v49 = vld [vmem:[#allocation2 + $0x42c] sm:$0xf0]  ;;  %v3571_v1 = vld [vmem:[#allocation2 + $0x4] sm:$0xf] }
  0x3b   :  { %1319 = vmatpush.bf16.msrb.mxu0 %v3004_v13  ;;  %1311 = vmatmul.bf16.vlgmr.msra.gmra.mxu3 %v4008_v41  ;;  %v3083_v50 = vld [vmem:[#allocation2 + $0x520] sm:$0xf]  ;;  %v3737_v52 = vld [vmem:[#allocation2 + $0x52c] sm:$0xf0]  ;;  %v2956_v58 = vor.u32 %v3705_v49, %v2955_v48  ;;  %v2429_v3 = vld [vmem:[#allocation2 + $0x10] sm:$0xf0] }
  0x3c   :  { %1332 = vmatpush.bf16.msrb.mxu1 %v3132_v15  ;;  %1272 = vmatmul.bf16.vlgmr.msra.gmra.mxu0 %v4006_v34  ;;  %v2939_v57 = vld [vmem:[#allocation2 + $0x400] sm:$0xf]  ;;  %v3701_v59 = vld [vmem:[#allocation2 + $0x40c] sm:$0xf0]  ;;  %v3084_v62 = vor.u32 %v3737_v52, %v3083_v50  ;;  %v3603_v4 = vld [vmem:[#allocation2 + $0x104] sm:$0xf]  ;;  %v2432_v14 = vor.u32 %v3571_v1, %v2429_v3 }
  0x3d   :  { %1345 = vmatpush.bf16.msrb.mxu2 %v2496_v16  ;;  %1285 = vmatmul.bf16.vlgmr.msra.gmra.mxu1 %v4010_v42  ;;  %v3067_v60 = vld [vmem:[#allocation2 + $0x500] sm:$0xf]  ;;  %v3733_v0 = vld [vmem:[#allocation2 + $0x50c] sm:$0xf0]  ;;  %v2557_v5 = vld [vmem:[#allocation2 + $0x110] sm:$0xf0]  ;;  %v2940_v9 = vor.u32 %v3701_v59, %v2939_v57 }
  0x3e   :  { %1358 = vmatpush.bf16.msrb.mxu3 %v2624_v20  ;;  %v78_v61 = vld [vmem:[%s4167_s0 + $0x8] sm:$0xf]  ;;  %v3663_v6 = vld [vmem:[#allocation2 + $0x2e4] sm:$0xf]  ;;  %v2797_v7 = vld [vmem:[#allocation2 + $0x2f0] sm:$0xf0]  ;;  %v3068_v13 = vor.u32 %v3733_v0, %v3067_v60  ;;  %v2560_v17 = vor.u32 %v3603_v4, %v2557_v5 }
  0x3f   :  { %1320 = vmatpush.bf16.msrb.mxu0 %v2988_v27  ;;  %83 = vst [vmem:[#allocation1 + $0x20] ss:$4 sm:$0xff] %v78_v61  ;;  %v3695_v8 = vld [vmem:[#allocation2 + $0x3e4] sm:$0xf]  ;;  %v2925_v10 = vld [vmem:[#allocation2 + $0x3f0] sm:$0xf0]  ;;  %v2800_v18 = vor.u32 %v3663_v6, %v2797_v7 }
  0x40   :  { %1333 = vmatpush.bf16.msrb.mxu1 %v3116_v28  ;;  %v3727_v11 = vld [vmem:[#allocation2 + $0x4e4] sm:$0xf]  ;;  %v3053_v12 = vld [vmem:[#allocation2 + $0x4f0] sm:$0xf0]  ;;  %v2928_v22 = vor.u32 %v3695_v8, %v2925_v10 }
  0x41   :  { %1346 = vmatpush.bf16.msrb.mxu2 %v2480_v32  ;;  %v3759_v15 = vld [vmem:[#allocation2 + $0x5e4] sm:$0xf]  ;;  %v3181_v16 = vld [vmem:[#allocation2 + $0x5f0] sm:$0xf0]  ;;  %v3056_v23 = vor.u32 %v3727_v11, %v3053_v12 }
  0x42   :  { %1359 = vmatpush.bf16.msrb.mxu3 %v2608_v37  ;;  %v3659_v19 = vld [vmem:[#allocation2 + $0x2c4] sm:$0xf]  ;;  %v2781_v20 = vld [vmem:[#allocation2 + $0x2d0] sm:$0xf0]  ;;  %v3184_v27 = vor.u32 %v3759_v15, %v3181_v16 }
  0x43   :  { %1321 = vmatpush.bf16.msrb.mxu0 %v2972_v45  ;;  %v3691_v21 = vld [vmem:[#allocation2 + $0x3c4] sm:$0xf]  ;;  %v2909_v24 = vld [vmem:[#allocation2 + $0x3d0] sm:$0xf0]  ;;  %v2784_v35 = vor.u32 %v3659_v19, %v2781_v20 }
  0x44   :  { %1334 = vmatpush.bf16.msrb.mxu1 %v3100_v46  ;;  %v3723_v25 = vld [vmem:[#allocation2 + $0x4c4] sm:$0xf]  ;;  %v3037_v26 = vld [vmem:[#allocation2 + $0x4d0] sm:$0xf0]  ;;  %v2912_v37 = vor.u32 %v3691_v21, %v2909_v24 }
  0x45   :  { %1347 = vmatpush.bf16.msrb.mxu2 %v2464_v47  ;;  %v3755_v30 = vld [vmem:[#allocation2 + $0x5c4] sm:$0xf]  ;;  %v3165_v31 = vld [vmem:[#allocation2 + $0x5d0] sm:$0xf0]  ;;  %v3040_v38 = vor.u32 %v3723_v25, %v3037_v26 }
  0x46   :  { %1360 = vmatpush.bf16.msrb.mxu3 %v2592_v51  ;;  %v88_v28 = vld.sshfl [vmem:[#allocation1 + $0x20] sm:$0xff pattern:$0x73625140]  ;;  %v89_v29 = vld.sshfl [vmem:[#allocation1 + $0x28] sm:$0xff pattern:$0x73625140]  ;;  %v3168_v44 = vor.u32 %v3755_v30, %v3165_v31 }
  0x47   :  { %1322 = vmatpush.bf16.msrb.mxu0 %v2956_v58  ;;  %v4019_v32 = vpack.c.bf16 %v88_v28, %v88_v28  ;;  %v4021_v36 = vpack.c.bf16 %v89_v29, %v89_v29  ;;  %v3655_v39 = vld [vmem:[#allocation2 + $0x2a4] sm:$0xf]  ;;  %v2765_v40 = vld [vmem:[#allocation2 + $0x2b0] sm:$0xf0] }
  0x48   :  { %1335 = vmatpush.bf16.msrb.mxu1 %v3084_v62  ;;  %v3687_v43 = vld [vmem:[#allocation2 + $0x3a4] sm:$0xf]  ;;  %v2893_v45 = vld [vmem:[#allocation2 + $0x3b0] sm:$0xf0]  ;;  %v2768_v50 = vor.u32 %v3655_v39, %v2765_v40 }
  0x49   :  { %1348 = vmatpush.bf16.msrb.mxu2 %v2448_v63  ;;  %v3719_v46 = vld [vmem:[#allocation2 + $0x4a4] sm:$0xf]  ;;  %v3021_v47 = vld [vmem:[#allocation2 + $0x4b0] sm:$0xf0]  ;;  %v2896_v51 = vor.u32 %v3687_v43, %v2893_v45 }
  0x4a   :  { %1361 = vmatpush.bf16.msrb.mxu3 %v2576_v2  ;;  %v3751_v48 = vld [vmem:[#allocation2 + $0x5a4] sm:$0xf]  ;;  %v3149_v49 = vld [vmem:[#allocation2 + $0x5b0] sm:$0xf0]  ;;  %v3024_v52 = vor.u32 %v3719_v46, %v3021_v47 }
  0x4b   :  { %1323 = vmatpush.bf16.msrb.mxu0 %v2940_v9  ;;  %v3651_v53 = vld [vmem:[#allocation2 + $0x284] sm:$0xf]  ;;  %v2749_v54 = vld [vmem:[#allocation2 + $0x290] sm:$0xf0]  ;;  %v3152_v56 = vor.u32 %v3751_v48, %v3149_v49 }
  0x4c   :  { %1336 = vmatpush.bf16.msrb.mxu1 %v3068_v13  ;;  %v3683_v55 = vld [vmem:[#allocation2 + $0x384] sm:$0xf]  ;;  %v2877_v57 = vld [vmem:[#allocation2 + $0x390] sm:$0xf0]  ;;  %v2752_v62 = vor.u32 %v3651_v53, %v2749_v54  ;;  %v3602_v53 = vld [vmem:[#allocation2 + $0xf4] sm:$0xf0] }
  0x4d   :  { %1349 = vmatpush.bf16.msrb.mxu2 %v2432_v14  ;;  %v3715_v58 = vld [vmem:[#allocation2 + $0x484] sm:$0xf]  ;;  %v3005_v59 = vld [vmem:[#allocation2 + $0x490] sm:$0xf0]  ;;  %v2880_v63 = vor.u32 %v3683_v55, %v2877_v57  ;;  %v2675_v54 = vld [vmem:[#allocation2 + $0x1e8] sm:$0xf] }
  0x4e   :  { %1362 = vmatpush.bf16.msrb.mxu3 %v2560_v17  ;;  %1324 = vmatmul.bf16.vlgmr.msrb.gmra.mxu0 %v4019_v32  ;;  %v3747_v60 = vld [vmem:[#allocation2 + $0x584] sm:$0xf]  ;;  %v3133_v61 = vld [vmem:[#allocation2 + $0x590] sm:$0xf0]  ;;  %v3008_v0 = vor.u32 %v3715_v58, %v3005_v59  ;;  %v3634_v55 = vld [vmem:[#allocation2 + $0x1f4] sm:$0xf0] }
  0x4f   :  { %1368 = vmatpush.bf16.msra.mxu0 %v2800_v18  ;;  %1337 = vmatmul.bf16.vlgmr.msrb.gmra.mxu1 %v4021_v36  ;;  %v3647_v1 = vld [vmem:[#allocation2 + $0x264] sm:$0xf]  ;;  %v2733_v2 = vld [vmem:[#allocation2 + $0x270] sm:$0xf0]  ;;  %v3136_v4 = vor.u32 %v3747_v60, %v3133_v61  ;;  %v2803_v57 = vld [vmem:[#allocation2 + $0x2e8] sm:$0xf] }
  0x50   :  { %1381 = vmatpush.bf16.msra.mxu1 %v2928_v22  ;;  %1350 = vmatmul.bf16.vlgmr.msrb.gmra.mxu2 %v4006_v34  ;;  %v3679_v3 = vld [vmem:[#allocation2 + $0x364] sm:$0xf]  ;;  %v2861_v5 = vld [vmem:[#allocation2 + $0x370] sm:$0xf0]  ;;  %v2736_v10 = vor.u32 %v3647_v1, %v2733_v2  ;;  %v3666_v58 = vld [vmem:[#allocation2 + $0x2f4] sm:$0xf0]  ;;  %v2676_v1 = vor.u32 %v3634_v55, %v2675_v54 }
  0x51   :  { %1394 = vmatpush.bf16.msra.mxu2 %v3056_v23  ;;  %1363 = vmatmul.bf16.vlgmr.msrb.gmra.mxu3 %v4010_v42  ;;  %v3711_v6 = vld [vmem:[#allocation2 + $0x464] sm:$0xf]  ;;  %v2989_v7 = vld [vmem:[#allocation2 + $0x470] sm:$0xf0]  ;;  %v2864_v11 = vor.u32 %v3679_v3, %v2861_v5  ;;  %v2931_v61 = vld [vmem:[#allocation2 + $0x3e8] sm:$0xf]  ;;  %v2804_v2 = vor.u32 %v3666_v58, %v2803_v57 }
  0x52   :  { %1407 = vmatpush.bf16.msra.mxu3 %v3184_v27  ;;  %v3743_v8 = vld [vmem:[#allocation2 + $0x564] sm:$0xf]  ;;  %v3117_v9 = vld [vmem:[#allocation2 + $0x570] sm:$0xf0]  ;;  %v2992_v12 = vor.u32 %v3711_v6, %v2989_v7  ;;  %v2531_v3 = vld [vmem:[#allocation2 + $0xc8] sm:$0xf] }
  0x53   :  { %1369 = vmatpush.bf16.msra.mxu0 %v2784_v35  ;;  %v3643_v13 = vld [vmem:[#allocation2 + $0x244] sm:$0xf]  ;;  %v2717_v14 = vld [vmem:[#allocation2 + $0x250] sm:$0xf0]  ;;  %v3120_v16 = vor.u32 %v3743_v8, %v3117_v9  ;;  %v2659_v5 = vld [vmem:[#allocation2 + $0x1c8] sm:$0xf] }
  0x54   :  { %1382 = vmatpush.bf16.msra.mxu1 %v2912_v37  ;;  %v3675_v15 = vld [vmem:[#allocation2 + $0x344] sm:$0xf]  ;;  %v2845_v17 = vld [vmem:[#allocation2 + $0x350] sm:$0xf0]  ;;  %v2720_v22 = vor.u32 %v3643_v13, %v2717_v14  ;;  %v3630_v7 = vld [vmem:[#allocation2 + $0x1d4] sm:$0xf0] }
  0x55   :  { %1395 = vmatpush.bf16.msra.mxu2 %v3040_v38  ;;  %v3707_v18 = vld [vmem:[#allocation2 + $0x444] sm:$0xf]  ;;  %v2973_v19 = vld [vmem:[#allocation2 + $0x450] sm:$0xf0]  ;;  %v2848_v23 = vor.u32 %v3675_v15, %v2845_v17  ;;  %v2787_v8 = vld [vmem:[#allocation2 + $0x2c8] sm:$0xf]  ;;  %v2660_v13 = vor.u32 %v3630_v7, %v2659_v5 }
  0x56   :  { %1408 = vmatpush.bf16.msra.mxu3 %v3168_v44  ;;  %v3739_v20 = vld [vmem:[#allocation2 + $0x544] sm:$0xf]  ;;  %v3101_v21 = vld [vmem:[#allocation2 + $0x550] sm:$0xf0]  ;;  %v2976_v24 = vor.u32 %v3707_v18, %v2973_v19  ;;  %v3662_v9 = vld [vmem:[#allocation2 + $0x2d4] sm:$0xf0] }
  0x57   :  { %1370 = vmatpush.bf16.msra.mxu0 %v2768_v50  ;;  %v3639_v25 = vld [vmem:[#allocation2 + $0x224] sm:$0xf]  ;;  %v2701_v26 = vld [vmem:[#allocation2 + $0x230] sm:$0xf0]  ;;  %v3104_v28 = vor.u32 %v3739_v20, %v3101_v21  ;;  %v2788_v14 = vor.u32 %v3662_v9, %v2787_v8  ;;  %v2515_v15 = vld [vmem:[#allocation2 + $0xa8] sm:$0xf] }
  0x58   :  { %1383 = vmatpush.bf16.msra.mxu1 %v2896_v51  ;;  %v3671_v27 = vld [vmem:[#allocation2 + $0x324] sm:$0xf]  ;;  %v2829_v29 = vld [vmem:[#allocation2 + $0x330] sm:$0xf0]  ;;  %v2704_v38 = vor.u32 %v3639_v25, %v2701_v26  ;;  %v2643_v17 = vld [vmem:[#allocation2 + $0x1a8] sm:$0xf] }
  0x59   :  { %1396 = vmatpush.bf16.msra.mxu2 %v3024_v52  ;;  %v3703_v30 = vld [vmem:[#allocation2 + $0x424] sm:$0xf]  ;;  %v2957_v31 = vld [vmem:[#allocation2 + $0x430] sm:$0xf0]  ;;  %v2832_v44 = vor.u32 %v3671_v27, %v2829_v29  ;;  %v2547_v52 = vld [vmem:[#allocation2 + $0xe8] sm:$0xf] }
  0x5a   :  { %1409 = vmatpush.bf16.msra.mxu3 %v3152_v56  ;;  %v3735_v35 = vld [vmem:[#allocation2 + $0x524] sm:$0xf]  ;;  %v3085_v37 = vld [vmem:[#allocation2 + $0x530] sm:$0xf0]  ;;  %v2960_v45 = vor.u32 %v3703_v30, %v2957_v31  ;;  %v3626_v19 = vld [vmem:[#allocation2 + $0x1b4] sm:$0xf0] }
  0x5b   :  { %1371 = vmatpush.bf16.msra.mxu0 %v2752_v62  ;;  %v3635_v39 = vld [vmem:[#allocation2 + $0x204] sm:$0xf]  ;;  %v2685_v40 = vld [vmem:[#allocation2 + $0x210] sm:$0xf0]  ;;  %v3088_v49 = vor.u32 %v3735_v35, %v3085_v37  ;;  %v3698_v62 = vld [vmem:[#allocation2 + $0x3f4] sm:$0xf0]  ;;  %v2644_v25 = vor.u32 %v3626_v19, %v2643_v17 }
  0x5c   :  { %1384 = vmatpush.bf16.msra.mxu1 %v2880_v63  ;;  %v3667_v43 = vld [vmem:[#allocation2 + $0x304] sm:$0xf]  ;;  %v2813_v46 = vld [vmem:[#allocation2 + $0x310] sm:$0xf0]  ;;  %v2688_v56 = vor.u32 %v3635_v39, %v2685_v40  ;;  %v2932_v6 = vor.u32 %v3698_v62, %v2931_v61  ;;  %v2771_v20 = vld [vmem:[#allocation2 + $0x2a8] sm:$0xf] }
  0x5d   :  { %1397 = vmatpush.bf16.msra.mxu2 %v3008_v0  ;;  %v3699_v47 = vld [vmem:[#allocation2 + $0x404] sm:$0xf]  ;;  %v2941_v48 = vld [vmem:[#allocation2 + $0x410] sm:$0xf0]  ;;  %v2816_v59 = vor.u32 %v3667_v43, %v2813_v46  ;;  %v2548_v0 = vor.u32 %v3602_v53, %v2547_v52  ;;  %v3658_v21 = vld [vmem:[#allocation2 + $0x2b4] sm:$0xf0] }
  0x5e   :  { %1410 = vmatpush.bf16.msra.mxu3 %v3136_v4  ;;  %v3731_v50 = vld [vmem:[#allocation2 + $0x504] sm:$0xf]  ;;  %v3069_v51 = vld [vmem:[#allocation2 + $0x510] sm:$0xf0]  ;;  %v2944_v60 = vor.u32 %v3699_v47, %v2941_v48  ;;  %v3598_v4 = vld [vmem:[#allocation2 + $0xd4] sm:$0xf0]  ;;  %v2772_v26 = vor.u32 %v3658_v21, %v2771_v20 }
  0x5f   :  { %1372 = vmatpush.bf16.msra.mxu0 %v2736_v10  ;;  %v3072_v63 = vor.u32 %v3731_v50, %v3069_v51  ;;  %v2915_v10 = vld [vmem:[#allocation2 + $0x3c8] sm:$0xf]  ;;  %v3622_v31 = vld [vmem:[#allocation2 + $0x194] sm:$0xf0] }
  0x60   :  { %1385 = vmatpush.bf16.msra.mxu1 %v2864_v11  ;;  %v3694_v11 = vld [vmem:[#allocation2 + $0x3d4] sm:$0xf0]  ;;  %v2499_v27 = vld [vmem:[#allocation2 + $0x88] sm:$0xf] }
  0x61   :  { %1398 = vmatpush.bf16.msra.mxu2 %v2992_v12  ;;  %v2532_v12 = vor.u32 %v3598_v4, %v2531_v3  ;;  %v2916_v18 = vor.u32 %v3694_v11, %v2915_v10  ;;  %v2627_v29 = vld [vmem:[#allocation2 + $0x188] sm:$0xf]  ;;  %v3654_v37 = vld [vmem:[#allocation2 + $0x294] sm:$0xf0] }
  0x62   :  { %1411 = vmatpush.bf16.msra.mxu3 %v3120_v16  ;;  %v3594_v16 = vld [vmem:[#allocation2 + $0xb4] sm:$0xf0]  ;;  %v2755_v35 = vld [vmem:[#allocation2 + $0x288] sm:$0xf]  ;;  %v2628_v43 = vor.u32 %v3622_v31, %v2627_v29  ;;  %v3600_v31 = vld [vmem:[#allocation2 + $0xec] sm:$0xf] }
  0x63   :  { %1373 = vmatpush.bf16.msra.mxu0 %v2720_v22  ;;  %v2899_v22 = vld [vmem:[#allocation2 + $0x3a8] sm:$0xf]  ;;  %v3686_v39 = vld [vmem:[#allocation2 + $0x394] sm:$0xf0] }
  0x64   :  { %1386 = vmatpush.bf16.msra.mxu1 %v2848_v23  ;;  %v3690_v23 = vld [vmem:[#allocation2 + $0x3b4] sm:$0xf0]  ;;  %v2611_v47 = vld [vmem:[#allocation2 + $0x168] sm:$0xf] }
  0x65   :  { %1399 = vmatpush.bf16.msra.mxu2 %v2976_v24  ;;  %v2516_v24 = vor.u32 %v3594_v16, %v2515_v15  ;;  %v2900_v30 = vor.u32 %v3690_v23, %v2899_v22  ;;  %v3586_v46 = vld [vmem:[#allocation2 + $0x74] sm:$0xf0]  ;;  %v2739_v50 = vld [vmem:[#allocation2 + $0x268] sm:$0xf] }
  0x66   :  { %1412 = vmatpush.bf16.msra.mxu3 %v3104_v28  ;;  %v3590_v28 = vld [vmem:[#allocation2 + $0x94] sm:$0xf0]  ;;  %v2867_v52 = vld [vmem:[#allocation2 + $0x368] sm:$0xf] }
  0x67   :  { %1374 = vmatpush.bf16.msra.mxu0 %v2704_v38  ;;  %v2883_v38 = vld [vmem:[#allocation2 + $0x388] sm:$0xf]  ;;  %v2500_v40 = vor.u32 %v3590_v28, %v2499_v27  ;;  %v3650_v51 = vld [vmem:[#allocation2 + $0x274] sm:$0xf0] }
  0x68   :  { %1387 = vmatpush.bf16.msra.mxu1 %v2832_v44  ;;  %v2756_v44 = vor.u32 %v3654_v37, %v2755_v35  ;;  %v2884_v48 = vor.u32 %v3686_v39, %v2883_v38  ;;  %v3682_v53 = vld [vmem:[#allocation2 + $0x374] sm:$0xf0]  ;;  %v2467_v57 = vld [vmem:[#allocation2 + $0x48] sm:$0xf]  ;;  %v2549_v35 = vld [vmem:[#allocation2 + $0xf8] sm:$0xf0] }
  0x69   :  { %1400 = vmatpush.bf16.msra.mxu2 %v2960_v45  ;;  %v2483_v45 = vld [vmem:[#allocation2 + $0x68] sm:$0xf]  ;;  %v3582_v58 = vld [vmem:[#allocation2 + $0x54] sm:$0xf0]  ;;  %v3632_v39 = vld [vmem:[#allocation2 + $0x1ec] sm:$0xf] }
  0x6a   :  { %1413 = vmatpush.bf16.msra.mxu3 %v3088_v49  ;;  %v3618_v49 = vld [vmem:[#allocation2 + $0x174] sm:$0xf0]  ;;  %v2484_v54 = vor.u32 %v3586_v46, %v2483_v45  ;;  %v2723_v62 = vld [vmem:[#allocation2 + $0x248] sm:$0xf]  ;;  %v2552_v46 = vor.u32 %v3600_v31, %v2549_v35 }
  0x6b   :  { %1375 = vmatpush.bf16.msra.mxu0 %v2688_v56  ;;  %v2612_v55 = vor.u32 %v3618_v49, %v2611_v47  ;;  %v2740_v56 = vor.u32 %v3650_v51, %v2739_v50  ;;  %v3614_v61 = vld [vmem:[#allocation2 + $0x154] sm:$0xf0]  ;;  %v2451_v5 = vld [vmem:[#allocation2 + $0x28] sm:$0xf] }
  0x6c   :  { %1388 = vmatpush.bf16.msra.mxu1 %v2816_v59  ;;  %v2595_v59 = vld [vmem:[#allocation2 + $0x148] sm:$0xf]  ;;  %v3610_v9 = vld [vmem:[#allocation2 + $0x134] sm:$0xf0] }
  0x6d   :  { %1401 = vmatpush.bf16.msra.mxu2 %v2944_v60  ;;  %v2868_v60 = vor.u32 %v3682_v53, %v2867_v52  ;;  %v2596_v3 = vor.u32 %v3614_v61, %v2595_v59  ;;  %v2579_v7 = vld [vmem:[#allocation2 + $0x128] sm:$0xf]  ;;  %v3642_v11 = vld [vmem:[#allocation2 + $0x234] sm:$0xf0]  ;;  %v3596_v52 = vld [vmem:[#allocation2 + $0xcc] sm:$0xf] }
  0x6e   :  { %1414 = vmatpush.bf16.msra.mxu3 %v3072_v63  ;;  %1376 = vmatmul.bf16.vlgmr.msra.gmra.mxu0 %v4004_v33  ;;  %v3646_v63 = vld [vmem:[#allocation2 + $0x254] sm:$0xf0]  ;;  %v2707_v10 = vld [vmem:[#allocation2 + $0x228] sm:$0xf]  ;;  %v2580_v17 = vor.u32 %v3610_v9, %v2579_v7  ;;  %v2533_v53 = vld [vmem:[#allocation2 + $0xd8] sm:$0xf0] }
  0x6f   :  { %1420 = vmatpush.bf16.msrb.mxu0 %v2548_v0  ;;  %1389 = vmatmul.bf16.vlgmr.msra.gmra.mxu1 %v4008_v41  ;;  %v2851_v0 = vld [vmem:[#allocation2 + $0x348] sm:$0xf]  ;;  %v2724_v4 = vor.u32 %v3646_v63, %v2723_v62  ;;  %v3574_v16 = vld [vmem:[#allocation2 + $0x14] sm:$0xf0] }
  0x70   :  { %1433 = vmatpush.bf16.msrb.mxu1 %v2676_v1  ;;  %1402 = vmatmul.bf16.vlgmr.msra.gmra.mxu2 %v4019_v32  ;;  %v3678_v1 = vld [vmem:[#allocation2 + $0x354] sm:$0xf0]  ;;  %v2435_v15 = vld [vmem:[#allocation2 + $0x8] sm:$0xf] }
  0x71   :  { %1446 = vmatpush.bf16.msrb.mxu2 %v2804_v2  ;;  %1415 = vmatmul.bf16.vlgmr.msra.gmra.mxu3 %v4021_v36  ;;  %v2468_v2 = vor.u32 %v3582_v58, %v2467_v57  ;;  %v2852_v8 = vor.u32 %v3678_v1, %v2851_v0  ;;  %v2563_v19 = vld [vmem:[#allocation2 + $0x108] sm:$0xf]  ;;  %v3606_v20 = vld [vmem:[#allocation2 + $0x114] sm:$0xf0]  ;;  %v2436_v29 = vor.u32 %v3574_v16, %v2435_v15  ;;  %v3592_v0 = vld [vmem:[#allocation2 + $0xac] sm:$0xf] }
  0x72   :  { %1459 = vmatpush.bf16.msrb.mxu3 %v2932_v6  ;;  %v3578_v6 = vld [vmem:[#allocation2 + $0x34] sm:$0xf0]  ;;  %v2691_v21 = vld [vmem:[#allocation2 + $0x208] sm:$0xf]  ;;  %v2564_v37 = vor.u32 %v3606_v20, %v2563_v19  ;;  %v2536_v58 = vor.u32 %v3596_v52, %v2533_v53  ;;  %v2517_v1 = vld [vmem:[#allocation2 + $0xb8] sm:$0xf0] }
  0x73   :  { %1421 = vmatpush.bf16.msrb.mxu0 %v2532_v12  ;;  %v2835_v12 = vld [vmem:[#allocation2 + $0x328] sm:$0xf]  ;;  %v3638_v23 = vld [vmem:[#allocation2 + $0x214] sm:$0xf0]  ;;  %v2629_v15 = vld [vmem:[#allocation2 + $0x198] sm:$0xf0] }
  0x74   :  { %1434 = vmatpush.bf16.msrb.mxu1 %v2660_v13  ;;  %v3674_v13 = vld [vmem:[#allocation2 + $0x334] sm:$0xf0]  ;;  %v3187_v28 = vld [vmem:[#allocation2 + $0x5e8] sm:$0xf]  ;;  %v2692_v38 = vor.u32 %v3638_v23, %v2691_v21 }
  0x75   :  { %1447 = vmatpush.bf16.msrb.mxu2 %v2788_v14  ;;  %v2452_v14 = vor.u32 %v3578_v6, %v2451_v5  ;;  %v2836_v22 = vor.u32 %v3674_v13, %v2835_v12  ;;  %v3730_v27 = vld [vmem:[#allocation2 + $0x4f4] sm:$0xf0]  ;;  %v3043_v47 = vld [vmem:[#allocation2 + $0x4c8] sm:$0xf]  ;;  %v2520_v6 = vor.u32 %v3592_v0, %v2517_v1  ;;  %v3588_v12 = vld [vmem:[#allocation2 + $0x8c] sm:$0xf] }
  0x76   :  { %1460 = vmatpush.bf16.msrb.mxu3 %v2916_v18  ;;  %v2708_v18 = vor.u32 %v3642_v11, %v2707_v10  ;;  %v3171_v49 = vld [vmem:[#allocation2 + $0x5c8] sm:$0xf]  ;;  %v3758_v51 = vld [vmem:[#allocation2 + $0x5d4] sm:$0xf0]  ;;  %v2501_v13 = vld [vmem:[#allocation2 + $0x98] sm:$0xf0] }
  0x77   :  { %1422 = vmatpush.bf16.msrb.mxu0 %v2516_v24  ;;  %v2819_v24 = vld [vmem:[#allocation2 + $0x308] sm:$0xf]  ;;  %v3172_v57 = vor.u32 %v3758_v51, %v3171_v49  ;;  %v3754_v63 = vld [vmem:[#allocation2 + $0x5b4] sm:$0xf0]  ;;  %v3572_v1 = vld [vmem:[#allocation2 + $0xc] sm:$0xf] }
  0x78   :  { %1435 = vmatpush.bf16.msrb.mxu1 %v2644_v25  ;;  %v3670_v25 = vld [vmem:[#allocation2 + $0x314] sm:$0xf0]  ;;  %v3027_v59 = vld [vmem:[#allocation2 + $0x4a8] sm:$0xf] }
  0x79   :  { %1448 = vmatpush.bf16.msrb.mxu2 %v2772_v26  ;;  %v3059_v26 = vld [vmem:[#allocation2 + $0x4e8] sm:$0xf]  ;;  %v3750_v11 = vld [vmem:[#allocation2 + $0x594] sm:$0xf0] }
  0x7a   :  { %1461 = vmatpush.bf16.msrb.mxu3 %v2900_v30  ;;  %v3762_v30 = vld [vmem:[#allocation2 + $0x5f4] sm:$0xf0]  ;;  %v3155_v61 = vld [vmem:[#allocation2 + $0x5a8] sm:$0xf] }
  0x7b   :  { %1423 = vmatpush.bf16.msrb.mxu0 %v2500_v40  ;;  %v2677_v40 = vld [vmem:[#allocation2 + $0x1f8] sm:$0xf0]  ;;  %v3188_v45 = vor.u32 %v3762_v30, %v3187_v28  ;;  %v3156_v5 = vor.u32 %v3754_v63, %v3155_v61  ;;  %v3011_v7 = vld [vmem:[#allocation2 + $0x488] sm:$0xf]  ;;  %v3714_v20 = vld [vmem:[#allocation2 + $0x474] sm:$0xf0] }
  0x7c   :  { %1436 = vmatpush.bf16.msrb.mxu1 %v2628_v43  ;;  %v2820_v43 = vor.u32 %v3670_v25, %v2819_v24  ;;  %v2680_v50 = vor.u32 %v3632_v39, %v2677_v40  ;;  %v3139_v9 = vld [vmem:[#allocation2 + $0x588] sm:$0xf]  ;;  %v3746_v23 = vld [vmem:[#allocation2 + $0x574] sm:$0xf0]  ;;  %v3584_v24 = vld [vmem:[#allocation2 + $0x6c] sm:$0xf] }
  0x7d   :  { %1449 = vmatpush.bf16.msrb.mxu2 %v2756_v44  ;;  %v3060_v44 = vor.u32 %v3730_v27, %v3059_v26  ;;  %v2995_v19 = vld [vmem:[#allocation2 + $0x468] sm:$0xf]  ;;  %v2485_v25 = vld [vmem:[#allocation2 + $0x78] sm:$0xf0]  ;;  %v3616_v26 = vld [vmem:[#allocation2 + $0x16c] sm:$0xf] }
  0x7e   :  { %1462 = vmatpush.bf16.msrb.mxu3 %v2884_v48  ;;  %v3726_v48 = vld [vmem:[#allocation2 + $0x4d4] sm:$0xf0]  ;;  %v3123_v21 = vld [vmem:[#allocation2 + $0x568] sm:$0xf]  ;;  %v2613_v27 = vld [vmem:[#allocation2 + $0x178] sm:$0xf0]  ;;  %v2996_v28 = vor.u32 %v3714_v20, %v2995_v19  ;;  %v2488_v30 = vor.u32 %v3584_v24, %v2485_v25 }
  0x7f   :  { %1424 = vmatpush.bf16.msrb.mxu0 %v2484_v54  ;;  %v3628_v54 = vld [vmem:[#allocation2 + $0x1cc] sm:$0xf]  ;;  %v2979_v31 = vld [vmem:[#allocation2 + $0x448] sm:$0xf]  ;;  %v3710_v35 = vld [vmem:[#allocation2 + $0x454] sm:$0xf0] }
  0x80   :  { %1437 = vmatpush.bf16.msrb.mxu1 %v2612_v55  ;;  %v2661_v55 = vld [vmem:[#allocation2 + $0x1d8] sm:$0xf0]  ;;  %v3742_v39 = vld [vmem:[#allocation2 + $0x554] sm:$0xf0]  ;;  %v3580_v40 = vld [vmem:[#allocation2 + $0x4c] sm:$0xf] }
  0x81   :  { %1450 = vmatpush.bf16.msrb.mxu2 %v2740_v56  ;;  %v3044_v56 = vor.u32 %v3726_v48, %v3043_v47  ;;  %v2664_v62 = vor.u32 %v3628_v54, %v2661_v55  ;;  %v2963_v49 = vld [vmem:[#allocation2 + $0x428] sm:$0xf]  ;;  %v3738_v53 = vld [vmem:[#allocation2 + $0x534] sm:$0xf0]  ;;  %v3576_v54 = vld [vmem:[#allocation2 + $0x2c] sm:$0xf] }
  0x82   :  { %1463 = vmatpush.bf16.msrb.mxu3 %v2868_v60  ;;  %v3722_v60 = vld [vmem:[#allocation2 + $0x4b4] sm:$0xf0]  ;;  %v3091_v51 = vld [vmem:[#allocation2 + $0x528] sm:$0xf]  ;;  %v2453_v55 = vld [vmem:[#allocation2 + $0x38] sm:$0xf0] }
  0x83   :  { %1425 = vmatpush.bf16.msrb.mxu0 %v2468_v2  ;;  %v3624_v2 = vld [vmem:[#allocation2 + $0x1ac] sm:$0xf]  ;;  %v3092_v61 = vor.u32 %v3738_v53, %v3091_v51  ;;  %v3075_v63 = vld [vmem:[#allocation2 + $0x508] sm:$0xf]  ;;  %v3734_v0 = vld [vmem:[#allocation2 + $0x514] sm:$0xf0] }
  0x84   :  { %1438 = vmatpush.bf16.msrb.mxu1 %v2596_v3  ;;  %v2645_v3 = vld [vmem:[#allocation2 + $0x1b8] sm:$0xf0]  ;;  %v3652_v51 = vld [vmem:[#allocation2 + $0x28c] sm:$0xf] }
  0x85   :  { %1451 = vmatpush.bf16.msrb.mxu2 %v2724_v4  ;;  %v3028_v4 = vor.u32 %v3722_v60, %v3027_v59  ;;  %v2648_v10 = vor.u32 %v3624_v2, %v2645_v3  ;;  %v2947_v59 = vld [vmem:[#allocation2 + $0x408] sm:$0xf]  ;;  %v3702_v60 = vld [vmem:[#allocation2 + $0x414] sm:$0xf0]  ;;  %v2437_v3 = vld [vmem:[#allocation2 + $0x18] sm:$0xf0] }
  0x86   :  { %1464 = vmatpush.bf16.msrb.mxu3 %v2852_v8  ;;  %v3718_v8 = vld [vmem:[#allocation2 + $0x494] sm:$0xf0]  ;;  %v2917_v25 = vld [vmem:[#allocation2 + $0x3d8] sm:$0xf0]  ;;  %v3684_v53 = vld [vmem:[#allocation2 + $0x38c] sm:$0xf] }
  0x87   :  { %1426 = vmatpush.bf16.msrb.mxu0 %v2452_v14  ;;  %v3620_v14 = vld [vmem:[#allocation2 + $0x18c] sm:$0xf]  ;;  %v3012_v16 = vor.u32 %v3718_v8, %v3011_v7  ;;  %v2805_v7 = vld [vmem:[#allocation2 + $0x2f8] sm:$0xf0] }
  0x88   :  { %1439 = vmatpush.bf16.msrb.mxu1 %v2580_v17  ;;  %v3140_v17 = vor.u32 %v3750_v11, %v3139_v9  ;;  %v3696_v8 = vld [vmem:[#allocation2 + $0x3ec] sm:$0xf]  ;;  %v2948_v9 = vor.u32 %v3702_v60, %v2947_v59 }
  0x89   :  { %1452 = vmatpush.bf16.msrb.mxu2 %v2708_v18  ;;  %v2504_v18 = vor.u32 %v3588_v12, %v2501_v13  ;;  %v3728_v11 = vld [vmem:[#allocation2 + $0x4ec] sm:$0xf]  ;;  %v3061_v12 = vld [vmem:[#allocation2 + $0x4f8] sm:$0xf0]  ;;  %v3076_v13 = vor.u32 %v3734_v0, %v3075_v63 }
  0x8a   :  { %1465 = vmatpush.bf16.msrb.mxu3 %v2836_v22  ;;  %v2632_v22 = vor.u32 %v3620_v14, %v2629_v15  ;;  %v2440_v14 = vor.u32 %v3572_v1, %v2437_v3  ;;  %v3760_v15 = vld [vmem:[#allocation2 + $0x5ec] sm:$0xf]  ;;  %v3064_v20 = vor.u32 %v3728_v11, %v3061_v12  ;;  %v2869_v1 = vld [vmem:[#allocation2 + $0x378] sm:$0xf0] }
  0x8b   :  { %1427 = vmatpush.bf16.msrb.mxu0 %v2436_v29  ;;  %v3124_v29 = vor.u32 %v3746_v23, %v3123_v21  ;;  %v3660_v21 = vld [vmem:[#allocation2 + $0x2cc] sm:$0xf]  ;;  %v2997_v3 = vld [vmem:[#allocation2 + $0x478] sm:$0xf0] }
  0x8c   :  { %1440 = vmatpush.bf16.msrb.mxu1 %v2564_v37  ;;  %v3107_v37 = vld [vmem:[#allocation2 + $0x548] sm:$0xf]  ;;  %v3692_v23 = vld [vmem:[#allocation2 + $0x3cc] sm:$0xf] }
  0x8d   :  { %1453 = vmatpush.bf16.msrb.mxu2 %v2692_v38  ;;  %v2616_v38 = vor.u32 %v3616_v26, %v2613_v27  ;;  %v3108_v47 = vor.u32 %v3742_v39, %v3107_v37  ;;  %v3724_v26 = vld [vmem:[#allocation2 + $0x4cc] sm:$0xf]  ;;  %v3045_v27 = vld [vmem:[#allocation2 + $0x4d8] sm:$0xf0] }
  0x8e   :  { %1466 = vmatpush.bf16.msrb.mxu3 %v2820_v43  ;;  %1428 = vmatmul.bf16.vlgmr.msrb.gmra.mxu0 %v4006_v34  ;;  %v2469_v43 = vld [vmem:[#allocation2 + $0x58] sm:$0xf0]  ;;  %v3656_v37 = vld [vmem:[#allocation2 + $0x2ac] sm:$0xf] }
  0x8f   :  { %1472 = vmatpush.bf16.msra.mxu0 %v3060_v44  ;;  %1441 = vmatmul.bf16.vlgmr.msrb.gmra.mxu1 %v4010_v42  ;;  %v3612_v44 = vld [vmem:[#allocation2 + $0x14c] sm:$0xf]  ;;  %v2472_v48 = vor.u32 %v3580_v40, %v2469_v43  ;;  %v2901_v43 = vld [vmem:[#allocation2 + $0x3b8] sm:$0xf0] }
  0x90   :  { %1485 = vmatpush.bf16.msra.mxu1 %v3188_v45  ;;  %1454 = vmatmul.bf16.vlgmr.msrb.gmra.mxu2 %v4004_v33  ;;  %v2597_v45 = vld [vmem:[#allocation2 + $0x158] sm:$0xf0]  ;;  %v3688_v39 = vld [vmem:[#allocation2 + $0x3ac] sm:$0xf] }
  0x91   :  { %1498 = vmatpush.bf16.msra.mxu2 %v2552_v46  ;;  %1467 = vmatmul.bf16.vlgmr.msrb.gmra.mxu3 %v4008_v41  ;;  %v2980_v46 = vor.u32 %v3710_v35, %v2979_v31  ;;  %v2600_v52 = vor.u32 %v3612_v44, %v2597_v45  ;;  %v2920_v31 = vor.u32 %v3692_v23, %v2917_v25  ;;  %v3720_v44 = vld [vmem:[#allocation2 + $0x4ac] sm:$0xf]  ;;  %v3029_v45 = vld [vmem:[#allocation2 + $0x4b8] sm:$0xf0] }
  0x92   :  { %1511 = vmatpush.bf16.msra.mxu3 %v2680_v50  ;;  %v3706_v50 = vld [vmem:[#allocation2 + $0x434] sm:$0xf0]  ;;  %v3048_v35 = vor.u32 %v3724_v26, %v3045_v27  ;;  %v3680_v63 = vld [vmem:[#allocation2 + $0x36c] sm:$0xf]  ;;  %v2837_v25 = vld [vmem:[#allocation2 + $0x338] sm:$0xf0] }
  0x93   :  { %1473 = vmatpush.bf16.msra.mxu0 %v3044_v56  ;;  %v3608_v56 = vld [vmem:[#allocation2 + $0x12c] sm:$0xf]  ;;  %v2965_v27 = vld [vmem:[#allocation2 + $0x438] sm:$0xf0] }
  0x94   :  { %1486 = vmatpush.bf16.msra.mxu1 %v3172_v57  ;;  %v2581_v57 = vld [vmem:[#allocation2 + $0x138] sm:$0xf0]  ;;  %v3676_v11 = vld [vmem:[#allocation2 + $0x34c] sm:$0xf] }
  0x95   :  { %1499 = vmatpush.bf16.msra.mxu2 %v2536_v58  ;;  %v2964_v58 = vor.u32 %v3706_v50, %v2963_v49  ;;  %v2584_v2 = vor.u32 %v3608_v56, %v2581_v57  ;;  %v2904_v49 = vor.u32 %v3688_v39, %v2901_v43  ;;  %v3032_v50 = vor.u32 %v3720_v44, %v3029_v45  ;;  %v3716_v56 = vld [vmem:[#allocation2 + $0x48c] sm:$0xf]  ;;  %v3013_v57 = vld [vmem:[#allocation2 + $0x498] sm:$0xf0] }
  0x96   :  { %1512 = vmatpush.bf16.msra.mxu3 %v2664_v62  ;;  %v2456_v62 = vor.u32 %v3576_v54, %v2453_v55  ;;  %v2885_v55 = vld [vmem:[#allocation2 + $0x398] sm:$0xf0]  ;;  %v3672_v23 = vld [vmem:[#allocation2 + $0x32c] sm:$0xf] }
  0x97   :  { %1474 = vmatpush.bf16.msra.mxu0 %v3028_v4  ;;  %v3604_v4 = vld [vmem:[#allocation2 + $0x10c] sm:$0xf]  ;;  %v2888_v60 = vor.u32 %v3684_v53, %v2885_v55  ;;  %v2693_v39 = vld [vmem:[#allocation2 + $0x218] sm:$0xf0]  ;;  %v4042_v53 = vld [vmem:[%s4169_s2] sm:$0xf] }
  0x98   :  { %1487 = vmatpush.bf16.msra.mxu1 %v3156_v5  ;;  %v2565_v5 = vld [vmem:[#allocation2 + $0x118] sm:$0xf0]  ;;  %v3704_v26 = vld [vmem:[#allocation2 + $0x42c] sm:$0xf]  ;;  %v3794_v55 = vld [vmem:[#allocation4 + $0xf4] sm:$0xf0] }
  0x99   :  { %1500 = vmatpush.bf16.msra.mxu2 %v2520_v6  ;;  %v3664_v6 = vld [vmem:[#allocation2 + $0x2ec] sm:$0xf]  ;;  %v2821_v43 = vld [vmem:[#allocation2 + $0x318] sm:$0xf0] }
  0x9a   :  { %1513 = vmatpush.bf16.msra.mxu3 %v2648_v10  ;;  %v2933_v10 = vld [vmem:[#allocation2 + $0x3f8] sm:$0xf0]  ;;  %v3700_v45 = vld [vmem:[#allocation2 + $0x40c] sm:$0xf] }
  0x9b   :  { %1475 = vmatpush.bf16.msra.mxu0 %v3012_v16  ;;  %v3189_v16 = vld [vmem:[#allocation2 + $0x5f8] sm:$0xf0]  ;;  %v2936_v19 = vor.u32 %v3696_v8, %v2933_v10 }
  0x9c   :  { %1488 = vmatpush.bf16.msra.mxu1 %v3140_v17  ;;  %v2568_v17 = vor.u32 %v3604_v4, %v2565_v5  ;;  %v3192_v24 = vor.u32 %v3760_v15, %v3189_v16  ;;  %v3744_v4 = vld [vmem:[#allocation2 + $0x56c] sm:$0xf]  ;;  %v3125_v5 = vld [vmem:[#allocation2 + $0x578] sm:$0xf0] }
  0x9d   :  { %1501 = vmatpush.bf16.msra.mxu2 %v2504_v18  ;;  %v2808_v18 = vor.u32 %v3664_v6, %v2805_v7  ;;  %v2872_v7 = vor.u32 %v3680_v63, %v2869_v1  ;;  %v2725_v10 = vld [vmem:[#allocation2 + $0x258] sm:$0xf0]  ;;  %v3128_v12 = vor.u32 %v3744_v4, %v3125_v5  ;;  %v3740_v16 = vld [vmem:[#allocation2 + $0x54c] sm:$0xf]  ;;  %v3307_v1 = vld [vmem:[#allocation4 + $0xe0] sm:$0xf] }
  0x9e   :  { %1514 = vmatpush.bf16.msra.mxu3 %v2632_v22  ;;  %v2789_v22 = vld [vmem:[#allocation2 + $0x2d8] sm:$0xf0]  ;;  %v3235_v5 = vld [vmem:[#allocation4 + $0x50] sm:$0xf] }
  0x9f   :  { %1476 = vmatpush.bf16.msra.mxu0 %v2996_v28  ;;  %v3756_v28 = vld [vmem:[#allocation2 + $0x5cc] sm:$0xf]  ;;  %v2981_v15 = vld [vmem:[#allocation2 + $0x458] sm:$0xf0] }
  0xa0   :  { %1489 = vmatpush.bf16.msra.mxu1 %v3124_v29  ;;  %v3173_v29 = vld [vmem:[#allocation2 + $0x5d8] sm:$0xf0] }
  0xa1   :  { %1502 = vmatpush.bf16.msra.mxu2 %v2488_v30  ;;  %v2792_v30 = vor.u32 %v3660_v21, %v2789_v22  ;;  %v3176_v40 = vor.u32 %v3756_v28, %v3173_v29  ;;  %v3640_v21 = vld [vmem:[#allocation2 + $0x22c] sm:$0xf]  ;;  %v2709_v22 = vld [vmem:[#allocation2 + $0x238] sm:$0xf0] }
  0xa2   :  { %1515 = vmatpush.bf16.msra.mxu3 %v2616_v38  ;;  %v2773_v38 = vld [vmem:[#allocation2 + $0x2b8] sm:$0xf0]  ;;  %v3736_v28 = vld [vmem:[#allocation2 + $0x52c] sm:$0xf] }
  0xa3   :  { %1477 = vmatpush.bf16.msra.mxu0 %v2980_v46  ;;  %v3752_v46 = vld [vmem:[#allocation2 + $0x5ac] sm:$0xf]  ;;  %v3093_v29 = vld [vmem:[#allocation2 + $0x538] sm:$0xf0] }
  0xa4   :  { %1490 = vmatpush.bf16.msra.mxu1 %v3108_v47  ;;  %v3157_v47 = vld [vmem:[#allocation2 + $0x5b8] sm:$0xf0]  ;;  %v3096_v44 = vor.u32 %v3736_v28, %v3093_v29  ;;  %v3768_v28 = vld [vmem:[#allocation4 + $0x24] sm:$0xf0] }
  0xa5   :  { %1503 = vmatpush.bf16.msra.mxu2 %v2472_v48  ;;  %v2776_v48 = vor.u32 %v3656_v37, %v2773_v38  ;;  %v3160_v54 = vor.u32 %v3752_v46, %v3157_v47  ;;  %v2840_v37 = vor.u32 %v3672_v23, %v2837_v25  ;;  %v2968_v38 = vor.u32 %v3704_v26, %v2965_v27  ;;  %v2949_v46 = vld [vmem:[#allocation2 + $0x418] sm:$0xf0]  ;;  %v3732_v47 = vld [vmem:[#allocation2 + $0x50c] sm:$0xf]  ;;  %v3283_v23 = vld [vmem:[#allocation4 + $0xb0] sm:$0xf] }
  0xa6   :  { %1516 = vmatpush.bf16.msra.mxu3 %v2600_v52  ;;  %v2757_v52 = vld [vmem:[#allocation2 + $0x298] sm:$0xf0]  ;;  %v3211_v27 = vld [vmem:[#allocation4 + $0x20] sm:$0xf] }
  0xa7   :  { %1478 = vmatpush.bf16.msra.mxu0 %v2964_v58  ;;  %v3748_v58 = vld [vmem:[#allocation2 + $0x58c] sm:$0xf]  ;;  %v2760_v59 = vor.u32 %v3652_v51, %v2757_v52 }
  0xa8   :  { %1491 = vmatpush.bf16.msra.mxu1 %v3092_v61  ;;  %v3648_v61 = vld [vmem:[#allocation2 + $0x26c] sm:$0xf] }
  0xa9   :  { %1504 = vmatpush.bf16.msra.mxu2 %v2456_v62  ;;  %v2741_v62 = vld [vmem:[#allocation2 + $0x278] sm:$0xf0] }
  0xaa   :  { %1517 = vmatpush.bf16.msra.mxu3 %v2584_v2  ;;  %v3712_v2 = vld [vmem:[#allocation2 + $0x46c] sm:$0xf]  ;;  %v2744_v6 = vor.u32 %v3648_v61, %v2741_v62  ;;  %v3776_v61 = vld [vmem:[#allocation4 + $0x64] sm:$0xf0] }
  0xab   :  { %1479 = vmatpush.bf16.msra.mxu0 %v2948_v9  ;;  %v3000_v8 = vor.u32 %v3712_v2, %v2997_v3  ;;  %v3644_v9 = vld [vmem:[#allocation2 + $0x24c] sm:$0xf]  ;;  %v3792_v2 = vld [vmem:[#allocation4 + $0xe4] sm:$0xf0] }
  0xac   :  { %1492 = vmatpush.bf16.msra.mxu1 %v3076_v13  ;;  %v2853_v13 = vld [vmem:[#allocation2 + $0x358] sm:$0xf0] }
  0xad   :  { %1505 = vmatpush.bf16.msra.mxu2 %v2440_v14  ;;  %v3708_v14 = vld [vmem:[#allocation2 + $0x44c] sm:$0xf] }
  0xae   :  { %1518 = vmatpush.bf16.msra.mxu3 %v2568_v17  ;;  %1480 = vmatmul.bf16.vlgmr.msra.gmra.mxu0 %v4019_v32  ;;  %v3109_v17 = vld [vmem:[#allocation2 + $0x558] sm:$0xf0] }
  0xaf   :  { %1524 = vmatpush.bf16.msrb.mxu0 %v2808_v18  ;;  %1493 = vmatmul.bf16.vlgmr.msra.gmra.mxu1 %v4021_v36  ;;  %v2728_v18 = vor.u32 %v3644_v9, %v2725_v10  ;;  %v3299_v9 = vld [vmem:[#allocation4 + $0xd0] sm:$0xf]  ;;  %v3790_v10 = vld [vmem:[#allocation4 + $0xd4] sm:$0xf0] }
  0xb0   :  { %1537 = vmatpush.bf16.msrb.mxu1 %v2936_v19  ;;  %1506 = vmatmul.bf16.vlgmr.msra.gmra.mxu2 %v4006_v34  ;;  %v3141_v34 = vld [vmem:[#allocation2 + $0x598] sm:$0xf0]  ;;  %v2856_v19 = vor.u32 %v3676_v11, %v2853_v13 }
  0xb1   :  { %1550 = vmatpush.bf16.msrb.mxu2 %v3064_v20  ;;  %1519 = vmatmul.bf16.vlgmr.msra.gmra.mxu3 %v4010_v42  ;;  %v3016_v42 = vor.u32 %v3716_v56, %v3013_v57  ;;  %v3144_v0 = vor.u32 %v3748_v58, %v3141_v34  ;;  %v2984_v20 = vor.u32 %v3708_v14, %v2981_v15  ;;  %v3227_v14 = vld [vmem:[#allocation4 + $0x40] sm:$0xf] }
  0xb2   :  { %1563 = vmatpush.bf16.msrb.mxu3 %v3192_v24  ;;  %v3112_v24 = vor.u32 %v3740_v16, %v3109_v17  ;;  %v2952_v57 = vor.u32 %v3700_v45, %v2949_v46  ;;  %v3300_v16 = vor.u32 %v3790_v10, %v3299_v9  ;;  %v3291_v17 = vld [vmem:[#allocation4 + $0xc0] sm:$0xf] }
  0xb3   :  { %1525 = vmatpush.bf16.msrb.mxu0 %v2792_v30  ;;  %v2712_v30 = vor.u32 %v3640_v21, %v2709_v22  ;;  %v3770_v21 = vld [vmem:[#allocation4 + $0x34] sm:$0xf0] }
  0xb4   :  { %1538 = vmatpush.bf16.msrb.mxu1 %v2920_v31  ;;  %v3636_v31 = vld [vmem:[#allocation2 + $0x20c] sm:$0xf] }
  0xb5   :  { %1551 = vmatpush.bf16.msrb.mxu2 %v3048_v35  ;;  %v2696_v52 = vor.u32 %v3636_v31, %v2693_v39  ;;  %v3275_v31 = vld [vmem:[#allocation4 + $0xa0] sm:$0xf]  ;;  %v3212_v39 = vor.u32 %v3768_v28, %v3211_v27  ;;  %v3804_v28 = vld [vmem:[#allocation4 + $0x144] sm:$0xf0] }
  0xb6   :  { %1564 = vmatpush.bf16.msrb.mxu3 %v3176_v40  ;;  %v3668_v40 = vld [vmem:[#allocation2 + $0x30c] sm:$0xf]  ;;  %v3355_v27 = vld [vmem:[#allocation4 + $0x140] sm:$0xf] }
  0xb7   :  { %1526 = vmatpush.bf16.msrb.mxu0 %v2776_v48  ;;  %v3077_v48 = vld [vmem:[#allocation2 + $0x518] sm:$0xf0]  ;;  %v2824_v56 = vor.u32 %v3668_v40, %v2821_v43  ;;  %v3203_v43 = vld [vmem:[#allocation4 + $0x10] sm:$0xf] }
  0xb8   :  { %1539 = vmatpush.bf16.msrb.mxu1 %v2904_v49  ;;  %v3251_v49 = vld [vmem:[#allocation4 + $0x70] sm:$0xf]  ;;  %v3080_v58 = vor.u32 %v3732_v47, %v3077_v48  ;;  %v3782_v48 = vld [vmem:[#allocation4 + $0x94] sm:$0xf0] }
  0xb9   :  { %1552 = vmatpush.bf16.msrb.mxu2 %v3032_v50  ;;  %v1273_v35 = vpop.f32.mrf.mxu0  ;;  %v3778_v50 = vld [vmem:[#allocation4 + $0x74] sm:$0xf0]  ;;  %v3267_v47 = vld [vmem:[#allocation4 + $0x90] sm:$0xf] }
  0xba   :  { %1565 = vmatpush.bf16.msrb.mxu3 %v3160_v54  ;;  %v1286_v51 = vpop.f32.mrf.mxu1  ;;  %v3315_v54 = vld [vmem:[#allocation4 + $0xf0] sm:$0xf]  ;;  %v3252_v34 = vor.u32 %v3778_v50, %v3251_v49 }
  0xbb   :  { %1527 = vmatpush.bf16.msrb.mxu0 %v2760_v59  ;;  %v3316_v63 = vor.u32 %v3794_v55, %v3315_v54  ;;  %v3777_v54 = vld [vmem:[#allocation4 + $0x74] sm:$0xf]  ;;  %v3268_v55 = vor.u32 %v3782_v48, %v3267_v47 }
  0xbc   :  { %1540 = vmatpush.bf16.msrb.mxu1 %v2888_v60  ;;  %v296_v60 = vperm.slane %v4042_v53, 0 }
  0xbd   :  { %1553 = vmatpush.bf16.msrb.mxu2 %v3016_v42  ;;  %v1299_v59 = vpop.f32.mrf.mxu2  ;;  %v3243_v42 = vld [vmem:[#allocation4 + $0x60] sm:$0xf] }
  0xbe   :  { %1566 = vmatpush.bf16.msrb.mxu3 %v3144_v0  ;;  %v1312_v62 = vpop.f32.mrf.mxu3  ;;  %v3244_v3 = vor.u32 %v3776_v61, %v3243_v42  ;;  %v1274_v4 = vadd.f32 %v1273_v35, %v296_v60  ;;  %v3784_v35 = vld [vmem:[#allocation4 + $0xa4] sm:$0xf0]  ;;  %v3793_v60 = vld [vmem:[#allocation4 + $0xf4] sm:$0xf]  ;;  %v3317_v42 = vld [vmem:[#allocation4 + $0xf8] sm:$0xf0] }
  0xbf   :  { %1528 = vmatpush.bf16.msrb.mxu0 %v2744_v6  ;;  %v3774_v6 = vld [vmem:[#allocation4 + $0x54] sm:$0xf0]  ;;  %v3276_v45 = vor.u32 %v3784_v35, %v3275_v31  ;;  %v3769_v31 = vld [vmem:[#allocation4 + $0x34] sm:$0xf]  ;;  %v3221_v35 = vld [vmem:[#allocation4 + $0x38] sm:$0xf0] }
  0xc0   :  { %1541 = vmatpush.bf16.msrb.mxu1 %v2872_v7  ;;  %v3236_v11 = vor.u32 %v3774_v6, %v3235_v5  ;;  %v1287_v13 = vadd.f32 %v1286_v51, %v1274_v4  ;;  %v3195_v51 = vld [vmem:[#allocation4] sm:$0xf]  ;;  %v297_v4 = vperm.slane %v4042_v53, 1  ;;  %v3791_v5 = vld [vmem:[#allocation4 + $0xe4] sm:$0xf]  ;;  %v3224_v48 = vor.u32 %v3769_v31, %v3221_v35 }
  0xc1   :  { %1554 = vmatpush.bf16.msrb.mxu2 %v3000_v8  ;;  %v1275_v0 = vpop.f32.mrf.mxu0  ;;  %v3308_v8 = vor.u32 %v3792_v2, %v3307_v1  ;;  %v3775_v1 = vld [vmem:[#allocation4 + $0x64] sm:$0xf]  ;;  %v3245_v2 = vld [vmem:[#allocation4 + $0x68] sm:$0xf0] }
  0xc2   :  { %1567 = vmatpush.bf16.msrb.mxu3 %v3128_v12  ;;  %v1288_v7 = vpop.f32.mrf.mxu1  ;;  %v3309_v6 = vld [vmem:[#allocation4 + $0xe8] sm:$0xf0]  ;;  %v3248_v10 = vor.u32 %v3775_v1, %v3245_v2  ;;  %v3781_v1 = vld [vmem:[#allocation4 + $0x94] sm:$0xf]  ;;  %v3269_v2 = vld [vmem:[#allocation4 + $0x98] sm:$0xf0] }
  0xc3   :  { %1529 = vmatpush.bf16.msrb.mxu0 %v2728_v18  ;;  %v3788_v18 = vld [vmem:[#allocation4 + $0xc4] sm:$0xf0]  ;;  %v3379_v7 = vld [vmem:[#allocation4 + $0x170] sm:$0xf] }
  0xc4   :  { %1542 = vmatpush.bf16.msrb.mxu1 %v2856_v19 }
  0xc5   :  { %1555 = vmatpush.bf16.msrb.mxu2 %v2984_v20  ;;  %v1301_v12 = vpop.f32.mrf.mxu2  ;;  %v1300_v20 = vadd.f32 %v1299_v59, %v1287_v13  ;;  %v3808_v13 = vld [vmem:[#allocation4 + $0x164] sm:$0xf0] }
  0xc6   :  { %1568 = vmatpush.bf16.msrb.mxu3 %v3112_v24  ;;  %v1314_v15 = vpop.f32.mrf.mxu3  ;;  %v3786_v24 = vld [vmem:[#allocation4 + $0xb4] sm:$0xf0]  ;;  %v3371_v12 = vld [vmem:[#allocation4 + $0x160] sm:$0xf] }
  0xc7   :  { %1530 = vmatpush.bf16.msrb.mxu0 %v2712_v30  ;;  %v1313_v26 = vadd.f32 %v1312_v62, %v1300_v20  ;;  %v3284_v29 = vor.u32 %v3786_v24, %v3283_v23  ;;  %v3312_v15 = vor.u32 %v3791_v5, %v3309_v6  ;;  %v3806_v20 = vld [vmem:[#allocation4 + $0x154] sm:$0xf0]  ;;  %v3787_v24 = vld [vmem:[#allocation4 + $0xc4] sm:$0xf]  ;;  %v3331_v6 = vld [vmem:[#allocation4 + $0x110] sm:$0xf] }
  0xc8   :  { %1543 = vmatpush.bf16.msrb.mxu1 %v2840_v37 }
  0xc9   :  { %1556 = vmatpush.bf16.msrb.mxu2 %v2968_v38 }
  0xca   :  { %1569 = vmatpush.bf16.msrb.mxu3 %v3096_v44  ;;  %v3766_v44 = vld [vmem:[#allocation4 + $0x14] sm:$0xf0] }
  0xcb   :  { %1531 = vmatpush.bf16.msrb.mxu0 %v2696_v52  ;;  %v1325_v19 = vpop.f32.mrf.mxu0  ;;  %v3204_v49 = vor.u32 %v3766_v44, %v3203_v43  ;;  %v3764_v52 = vld [vmem:[#allocation4 + $0x4] sm:$0xf0]  ;;  %v3785_v43 = vld [vmem:[#allocation4 + $0xb4] sm:$0xf]  ;;  %v3285_v44 = vld [vmem:[#allocation4 + $0xb8] sm:$0xf0] }
  0xcc   :  { %1544 = vmatpush.bf16.msrb.mxu1 %v2824_v56  ;;  %v1338_v22 = vpop.f32.mrf.mxu1  ;;  %v1326_v40 = vadd.f32 %v1325_v19, %v1313_v26  ;;  %v3253_v56 = vld [vmem:[#allocation4 + $0x78] sm:$0xf0]  ;;  %v3196_v61 = vor.u32 %v3764_v52, %v3195_v51  ;;  %v3372_v19 = vor.u32 %v3808_v13, %v3371_v12  ;;  %v3288_v51 = vor.u32 %v3785_v43, %v3285_v44  ;;  %v3197_v12 = vld [vmem:[#allocation4 + $0x8] sm:$0xf0]  ;;  %v3803_v44 = vld [vmem:[#allocation4 + $0x144] sm:$0xf] }
  0xcd   :  { %1557 = vmatpush.bf16.msrb.mxu2 %v2952_v57  ;;  %v3272_v13 = vor.u32 %v3781_v1, %v3269_v2  ;;  %v3403_v2 = vld [vmem:[#allocation4 + $0x1a0] sm:$0xf] }
  0xce   :  { %1570 = vmatpush.bf16.msrb.mxu3 %v3080_v58  ;;  %1532 = vmatmul.bf16.vlgmr.msrb.gmra.mxu0 %v4004_v33  ;;  %v3772_v33 = vld [vmem:[#allocation4 + $0x44] sm:$0xf0]  ;;  %v1339_v50 = vadd.f32 %v1338_v22, %v1326_v40  ;;  %v3259_v58 = vld [vmem:[#allocation4 + $0x80] sm:$0xf]  ;;  %v3229_v22 = vld [vmem:[#allocation4 + $0x48] sm:$0xf0] }
  0xcf   :  { %1974 = vmatpush.bf16.msra.mxu0 %v3252_v34  ;;  %1545 = vmatmul.bf16.vlgmr.msrb.gmra.mxu1 %v4008_v41  ;;  %v3228_v41 = vor.u32 %v3772_v33, %v3227_v14  ;;  %v3780_v34 = vld [vmem:[#allocation4 + $0x84] sm:$0xf0]  ;;  %v3773_v14 = vld [vmem:[#allocation4 + $0x54] sm:$0xf]  ;;  %v3237_v33 = vld [vmem:[#allocation4 + $0x58] sm:$0xf0] }
  0xd0   :  { %1987 = vmatpush.bf16.msra.mxu1 %v3316_v63  ;;  %1558 = vmatmul.bf16.vlgmr.msrb.gmra.mxu2 %v4019_v32  ;;  %v3219_v32 = vld [vmem:[#allocation4 + $0x30] sm:$0xf]  ;;  %v1576_v62 = vmax.f32 %v1339_v50, 0.0  ;;  %v3256_v63 = vor.u32 %v3777_v54, %v3253_v56  ;;  %v3260_v0 = vor.u32 %v3780_v34, %v3259_v58  ;;  %v3213_v50 = vld [vmem:[#allocation4 + $0x28] sm:$0xf0] }
  0xd1   :  { %1571 = vmatmul.bf16.vlgmr.msrb.gmra.mxu3 %v4021_v36  ;;  %v3292_v36 = vor.u32 %v3788_v18, %v3291_v17  ;;  %v3220_v25 = vor.u32 %v3770_v21, %v3219_v32  ;;  %v3789_v17 = vld [vmem:[#allocation4 + $0xd4] sm:$0xf]  ;;  %v3301_v18 = vld [vmem:[#allocation4 + $0xd8] sm:$0xf0]  ;;  %v3240_v32 = vor.u32 %v3773_v14, %v3237_v33  ;;  %v3771_v21 = vld [vmem:[#allocation4 + $0x44] sm:$0xf] }
  0xd2   :  { %v4052_v9 = vpack.c.bf16 %v1576_v62, %v1576_v62  ;;  %v3783_v54 = vld [vmem:[#allocation4 + $0xa4] sm:$0xf]  ;;  %v3339_v34 = vld [vmem:[#allocation4 + $0x120] sm:$0xf]  ;;  %v3205_v62 = vld [vmem:[#allocation4 + $0x18] sm:$0xf0] }
  0xd3   :  { %1975 = vmatpush.bf16.msra.mxu0 %v3244_v3  ;;  %v1351_v30 = vpop.f32.mrf.mxu2  ;;  %v1327_v38 = vpop.f32.mrf.mxu0  ;;  %v3320_v3 = vor.u32 %v3793_v60, %v3317_v42  ;;  %v3779_v14 = vld [vmem:[#allocation4 + $0x84] sm:$0xf]  ;;  %v3261_v33 = vld [vmem:[#allocation4 + $0x88] sm:$0xf0] }
  0xd4   :  { %1988 = vmatpush.bf16.msra.mxu1 %v3308_v8  ;;  %v4049_v37 = vpop.f32.mrf.mxu3  ;;  %v1340_v46 = vpop.f32.mrf.mxu1  ;;  %v3810_v8 = vld [vmem:[#allocation4 + $0x174] sm:$0xf0] }
  0xd5   :  { %v3802_v46 = vld [vmem:[#allocation4 + $0x134] sm:$0xf0] }
  0xd7   :  { %1976 = vmatpush.bf16.msra.mxu0 %v3236_v11  ;;  %v3380_v11 = vor.u32 %v3810_v8, %v3379_v7  ;;  %v3798_v7 = vld [vmem:[#allocation4 + $0x114] sm:$0xf0] }
  0xd8   :  { %1989 = vmatpush.bf16.msra.mxu1 %v3300_v16  ;;  %v1352_v16 = vadd.f32 %v1351_v30, %v297_v4 }
  0xd9   :  { %2000 = vmatpush.bf16.msra.mxu2 %v3380_v11  ;;  %v3763_v11 = vld [vmem:[#allocation4 + $0x4] sm:$0xf] }
  0xda   :  { %v1365_v23 = vadd.f32 %v4049_v37, %v1352_v16  ;;  %v3347_v37 = vld [vmem:[#allocation4 + $0x130] sm:$0xf]  ;;  %v3332_v16 = vor.u32 %v3798_v7, %v3331_v6  ;;  %v3795_v7 = vld [vmem:[#allocation4 + $0x104] sm:$0xf] }
  0xdb   :  { %1977 = vmatpush.bf16.msra.mxu0 %v3228_v41  ;;  %v1353_v57 = vpop.f32.mrf.mxu2  ;;  %v3363_v41 = vld [vmem:[#allocation4 + $0x150] sm:$0xf]  ;;  %v3348_v56 = vor.u32 %v3802_v46, %v3347_v37  ;;  %v3822_v46 = vld [vmem:[#allocation4 + $0x1d4] sm:$0xf0] }
  0xdc   :  { %1990 = vmatpush.bf16.msra.mxu1 %v3292_v36  ;;  %v1366_v59 = vpop.f32.mrf.mxu3  ;;  %v3304_v36 = vor.u32 %v3789_v17, %v3301_v18  ;;  %v3364_v26 = vor.u32 %v3806_v20, %v3363_v41  ;;  %v3323_v18 = vld [vmem:[#allocation4 + $0x100] sm:$0xf]  ;;  %v3200_v41 = vor.u32 %v3763_v11, %v3197_v12  ;;  %v3809_v20 = vld [vmem:[#allocation4 + $0x174] sm:$0xf]  ;;  %v3427_v37 = vld [vmem:[#allocation4 + $0x1d0] sm:$0xf] }
  0xdd   :  { %2001 = vmatpush.bf16.msra.mxu2 %v3372_v19  ;;  %v3800_v59 = vld [vmem:[#allocation4 + $0x124] sm:$0xf0]  ;;  %v3395_v12 = vld [vmem:[#allocation4 + $0x190] sm:$0xf] }
  0xde   :  { %v3340_v4 = vor.u32 %v3800_v59, %v3339_v34  ;;  %v3796_v19 = vld [vmem:[#allocation4 + $0x104] sm:$0xf0]  ;;  %v3341_v59 = vld [vmem:[#allocation4 + $0x128] sm:$0xf0] }
  0xdf   :  { %1978 = vmatpush.bf16.msra.mxu0 %v3220_v25  ;;  %v3293_v25 = vld [vmem:[#allocation4 + $0xc8] sm:$0xf0] }
  0xe0   :  { %1991 = vmatpush.bf16.msra.mxu1 %v3284_v29  ;;  %v3232_v29 = vor.u32 %v3771_v21, %v3229_v22  ;;  %v3296_v38 = vor.u32 %v3787_v24, %v3293_v25  ;;  %v3264_v21 = vor.u32 %v3779_v14, %v3261_v33  ;;  %v3324_v22 = vor.u32 %v3796_v19, %v3323_v18  ;;  %v3373_v24 = vld [vmem:[#allocation4 + $0x168] sm:$0xf0]  ;;  %v3812_v18 = vld [vmem:[#allocation4 + $0x184] sm:$0xf0] }
  0xe1   :  { %2002 = vmatpush.bf16.msra.mxu2 %v3364_v26  ;;  %v3443_v26 = vld [vmem:[#allocation4 + $0x1f0] sm:$0xf] }
  0xe3   :  { %1979 = vmatpush.bf16.msra.mxu0 %v3212_v39 }
  0xe4   :  { %1992 = vmatpush.bf16.msra.mxu1 %v3276_v45  ;;  %v3356_v45 = vor.u32 %v3804_v28, %v3355_v27  ;;  %v3826_v27 = vld [vmem:[#allocation4 + $0x1f4] sm:$0xf0] }
  0xe5   :  { %v3444_v28 = vor.u32 %v3826_v27, %v3443_v26 }
  0xe6   :  { %2003 = vmatpush.bf16.msra.mxu2 %v3356_v45  ;;  %v3357_v45 = vld [vmem:[#allocation4 + $0x148] sm:$0xf0] }
  0xe7   :  { %1980 = vmatpush.bf16.msra.mxu0 %v3204_v49  ;;  %v3767_v49 = vld [vmem:[#allocation4 + $0x24] sm:$0xf]  ;;  %2013 = vmatpush.bf16.msra.mxu3 %v3444_v28  ;;  %v3821_v28 = vld [vmem:[#allocation4 + $0x1d4] sm:$0xf] }
  0xe8   :  { %1993 = vmatpush.bf16.msra.mxu1 %v3268_v55  ;;  %v3277_v55 = vld [vmem:[#allocation4 + $0xa8] sm:$0xf0]  ;;  %v3216_v60 = vor.u32 %v3767_v49, %v3213_v50  ;;  %v3801_v49 = vld [vmem:[#allocation4 + $0x134] sm:$0xf]  ;;  %v3349_v50 = vld [vmem:[#allocation4 + $0x138] sm:$0xf0] }
  0xea   :  { %2004 = vmatpush.bf16.msra.mxu2 %v3348_v56  ;;  %v3820_v56 = vld [vmem:[#allocation4 + $0x1c4] sm:$0xf0] }
  0xeb   :  { %1981 = vmatpush.bf16.msra.mxu0 %v3196_v61  ;;  %v1377_v30 = vpop.f32.mrf.mxu0  ;;  %v3765_v61 = vld [vmem:[#allocation4 + $0x14] sm:$0xf] }
  0xec   :  { %1994 = vmatpush.bf16.msra.mxu1 %v3260_v0  ;;  %v1378_v39 = vadd.f32 %v1377_v30, %v1365_v23  ;;  %v1390_v40 = vpop.f32.mrf.mxu1  ;;  %v3208_v8 = vor.u32 %v3765_v61, %v3205_v62  ;;  %v3807_v23 = vld [vmem:[#allocation4 + $0x164] sm:$0xf]  ;;  %v3365_v30 = vld [vmem:[#allocation4 + $0x158] sm:$0xf0]  ;;  %v298_v62 = vperm.slane %v4042_v53, 2 }
  0xed   :  { %v3376_v25 = vor.u32 %v3807_v23, %v3373_v24  ;;  %v3437_v23 = vld [vmem:[#allocation4 + $0x1e8] sm:$0xf0] }
  0xee   :  { %1982 = vmatmul.bf16.vlgmr.msra.gmra.mxu0 %v4052_v9  ;;  %v1391_v47 = vadd.f32 %v1390_v40, %v1378_v39  ;;  %2005 = vmatpush.bf16.msra.mxu2 %v3340_v4  ;;  %v3435_v39 = vld [vmem:[#allocation4 + $0x1e0] sm:$0xf]  ;;  %v3824_v40 = vld [vmem:[#allocation4 + $0x1e4] sm:$0xf0] }
  0xef   :  { %2026 = vmatpush.bf16.msrb.mxu0 %v3256_v63  ;;  %v3280_v63 = vor.u32 %v3783_v54, %v3277_v55  ;;  %v3436_v43 = vor.u32 %v3824_v40, %v3435_v39  ;;  %v3352_v54 = vor.u32 %v3801_v49, %v3349_v50  ;;  %v3419_v55 = vld [vmem:[#allocation4 + $0x1c0] sm:$0xf]  ;;  %v3405_v49 = vld [vmem:[#allocation4 + $0x1a8] sm:$0xf0] }
  0xf0   :  { %2039 = vmatpush.bf16.msrb.mxu1 %v3320_v3  ;;  %v3420_v34 = vor.u32 %v3820_v56, %v3419_v55  ;;  %v3397_v55 = vld [vmem:[#allocation4 + $0x198] sm:$0xf0] }
  0xf1   :  { %2014 = vmatpush.bf16.msra.mxu3 %v3436_v43  ;;  %v3819_v43 = vld [vmem:[#allocation4 + $0x1c4] sm:$0xf] }
  0xf2   :  { %2006 = vmatpush.bf16.msra.mxu2 %v3332_v16 }
  0xf3   :  { %2027 = vmatpush.bf16.msrb.mxu0 %v3248_v10  ;;  %v1403_v52 = vpop.f32.mrf.mxu2  ;;  %v1379_v0 = vpop.f32.mrf.mxu0 }
  0xf4   :  { %2040 = vmatpush.bf16.msrb.mxu1 %v3312_v15  ;;  %v1404_v57 = vadd.f32 %v1403_v52, %v1391_v47  ;;  %v1416_v58 = vpop.f32.mrf.mxu3  ;;  %v1392_v3 = vpop.f32.mrf.mxu1  ;;  %v3428_v47 = vor.u32 %v3822_v46, %v3427_v37  ;;  %v3333_v0 = vld [vmem:[#allocation4 + $0x118] sm:$0xf0]  ;;  %v3817_v37 = vld [vmem:[#allocation4 + $0x1b4] sm:$0xf] }
  0xf5   :  { %v3816_v3 = vld [vmem:[#allocation4 + $0x1a4] sm:$0xf0]  ;;  %v3413_v46 = vld [vmem:[#allocation4 + $0x1b8] sm:$0xf0] }
  0xf6   :  { %v1417_v42 = vadd.f32 %v1416_v58, %v1404_v57  ;;  %2007 = vmatpush.bf16.msra.mxu2 %v3324_v22  ;;  %2015 = vmatpush.bf16.msra.mxu3 %v3428_v47  ;;  %v3799_v57 = vld [vmem:[#allocation4 + $0x124] sm:$0xf]  ;;  %v3404_v11 = vor.u32 %v3816_v3, %v3403_v2  ;;  %v3416_v47 = vor.u32 %v3817_v37, %v3413_v46  ;;  %v3835_v37 = vld [vmem:[%s4172_s5 + $0x40] sm:$0xff] }
  0xf7   :  { %2028 = vmatpush.bf16.msrb.mxu0 %v3240_v32  ;;  %v3381_v32 = vld [vmem:[#allocation4 + $0x178] sm:$0xf0]  ;;  %v3344_v61 = vor.u32 %v3799_v57, %v3341_v59  ;;  %v3811_v57 = vld [vmem:[#allocation4 + $0x184] sm:$0xf] }
  0xf8   :  { %2041 = vmatpush.bf16.msrb.mxu1 %v3304_v36  ;;  %v1577_v5 = vmax.f32 %v1417_v42, 0.0  ;;  %v3384_v36 = vor.u32 %v3809_v20, %v3381_v32  ;;  %v3818_v42 = vld [vmem:[#allocation4 + $0x1b4] sm:$0xf0]  ;;  %v3445_v20 = vld [vmem:[#allocation4 + $0x1f8] sm:$0xf0] }
  0xfa   :  { %v1581_v10 = vpack.c.bf16 %v1577_v5, %v1577_v5  ;;  %2052 = vmatpush.bf16.msrb.mxu2 %v3384_v36  ;;  %2016 = vmatpush.bf16.msra.mxu3 %v3420_v34  ;;  %v3823_v36 = vld [vmem:[#allocation4 + $0x1e4] sm:$0xf]  ;;  %v299_v34 = vperm.slane %v4042_v53, 3 }
  0xfb   :  { %2029 = vmatpush.bf16.msrb.mxu0 %v3232_v29  ;;  %v1405_v15 = vpop.f32.mrf.mxu2  ;;  %v3805_v29 = vld [vmem:[#allocation4 + $0x154] sm:$0xf]  ;;  %v3440_v26 = vor.u32 %v3823_v36, %v3437_v23  ;;  %v3833_v23 = vld [vmem:[%s4172_s5 + $0x30] sm:$0xff] }
  0xfc   :  { %2042 = vmatpush.bf16.msrb.mxu1 %v3296_v38  ;;  %v1418_v17 = vpop.f32.mrf.mxu3  ;;  %v3368_v35 = vor.u32 %v3805_v29, %v3365_v30  ;;  %v3429_v29 = vld [vmem:[#allocation4 + $0x1d8] sm:$0xf0]  ;;  %v3834_v36 = vld [vmem:[%s4172_s5 + $0x38] sm:$0xff] }
  0xfd   :  { %1995 = vmatmul.bf16.vlgmr.msra.gmra.mxu1 %v1581_v10  ;;  %v3387_v17 = vld [vmem:[#allocation4 + $0x180] sm:$0xf] }
  0xfe   :  { %2053 = vmatpush.bf16.msrb.mxu2 %v3376_v25  ;;  %v3388_v19 = vor.u32 %v3812_v18, %v3387_v17 }
  0xff   :  { %2030 = vmatpush.bf16.msrb.mxu0 %v3224_v48 }
 0x100   :  { %2043 = vmatpush.bf16.msrb.mxu1 %v3288_v51 }
 0x102   :  { %2054 = vmatpush.bf16.msrb.mxu2 %v3368_v35 }
 0x103   :  { %2031 = vmatpush.bf16.msrb.mxu0 %v3216_v60  ;;  %v3411_v60 = vld [vmem:[#allocation4 + $0x1b0] sm:$0xf] }
 0x104   :  { %2044 = vmatpush.bf16.msrb.mxu1 %v3280_v63  ;;  %v3797_v63 = vld [vmem:[#allocation4 + $0x114] sm:$0xf]  ;;  %v3412_v1 = vor.u32 %v3818_v42, %v3411_v60 }
 0x105   :  { %v3336_v4 = vor.u32 %v3797_v63, %v3333_v0 }
 0x106   :  { %2017 = vmatpush.bf16.msra.mxu3 %v3412_v1 }
 0x107   :  { %2032 = vmatpush.bf16.msrb.mxu0 %v3208_v8  ;;  %v3325_v8 = vld [vmem:[#allocation4 + $0x108] sm:$0xf0] }
 0x108   :  { %2045 = vmatpush.bf16.msrb.mxu1 %v3272_v13  ;;  %v3814_v13 = vld [vmem:[#allocation4 + $0x194] sm:$0xf0]  ;;  %v3328_v14 = vor.u32 %v3795_v7, %v3325_v8 }
 0x109   :  { %v3396_v15 = vor.u32 %v3814_v13, %v3395_v12  ;;  %v1648_v13 = vld [vmem:[%s4171_s4] sm:$0x3] }
 0x10a   :  { %2018 = vmatpush.bf16.msra.mxu3 %v3404_v11 }
 0x10b   :  { %2033 = vmatpush.bf16.msrb.mxu0 %v3200_v41  ;;  %v1429_v31 = vpop.f32.mrf.mxu0  ;;  %v3825_v41 = vld [vmem:[#allocation4 + $0x1f4] sm:$0xf] }
 0x10c   :  { %2046 = vmatpush.bf16.msrb.mxu1 %v3264_v21  ;;  %v1442_v38 = vpop.f32.mrf.mxu1  ;;  %v1430_v5 = vadd.f32 %v1429_v31, %v298_v62  ;;  %v3448_v21 = vor.u32 %v3825_v41, %v3445_v20  ;;  %v3432_v31 = vor.u32 %v3821_v28, %v3429_v29  ;;  %v3841_v28 = vld [vmem:[%s4172_s5 + $0x70] sm:$0xff] }
 0x10d   :  { %v3829_v29 = vld [vmem:[%s4172_s5 + $0x10] sm:$0xff] }
 0x10e   :  { %2034 = vmatmul.bf16.vlgmr.msrb.gmra.mxu0 %v4052_v9  ;;  %v3360_v9 = vor.u32 %v3803_v44, %v3357_v45  ;;  %v1443_v33 = vadd.f32 %v1442_v38, %v1430_v5  ;;  %2019 = vmatpush.bf16.msra.mxu3 %v3396_v15  ;;  %v3421_v44 = vld [vmem:[#allocation4 + $0x1c8] sm:$0xf0] }
 0x10f   :  { %2047 = vmatmul.bf16.vlgmr.msrb.gmra.mxu1 %v1581_v10  ;;  %2214 = vmatpush.bf16.msra.mxu0 %v3834_v36 }
 0x110   :  { %2055 = vmatpush.bf16.msrb.mxu2 %v3360_v9  ;;  %v3424_v9 = vor.u32 %v3819_v43, %v3421_v44  ;;  %v3838_v43 = vld [vmem:[%s4172_s5 + $0x58] sm:$0xff]  ;;  %v3837_v44 = vld [vmem:[%s4172_s5 + $0x50] sm:$0xff] }
 0x112   :  { %2020 = vmatpush.bf16.msra.mxu3 %v3388_v19  ;;  %v1651_v19 = vperm.slane %v1648_v13, 1 }
 0x113   :  { %v1455_v48 = vpop.f32.mrf.mxu2  ;;  %v1431_v51 = vpop.f32.mrf.mxu0  ;;  %2215 = vmatpush.bf16.msra.mxu0 %v3833_v23 }
 0x114   :  { %v1468_v52 = vpop.f32.mrf.mxu3  ;;  %v1444_v58 = vpop.f32.mrf.mxu1  ;;  %2056 = vmatpush.bf16.msrb.mxu2 %v3352_v54  ;;  %v1456_v16 = vadd.f32 %v1455_v48, %v1443_v33  ;;  %v3815_v48 = vld [vmem:[#allocation4 + $0x1a4] sm:$0xf]  ;;  %v3813_v54 = vld [vmem:[#allocation4 + $0x194] sm:$0xf] }
 0x115   :  { %v3408_v51 = vor.u32 %v3815_v48, %v3405_v49  ;;  %v3400_v56 = vor.u32 %v3813_v54, %v3397_v55  ;;  %v3389_v58 = vld [vmem:[#allocation4 + $0x188] sm:$0xf0] }
 0x116   :  { %v1469_v32 = vadd.f32 %v1468_v52, %v1456_v16  ;;  %2065 = vmatpush.bf16.msrb.mxu3 %v3448_v21  ;;  %v3392_v59 = vor.u32 %v3811_v57, %v3389_v58  ;;  %v3849_v48 = vld [vmem:[%s4174_s7 + $0x30] sm:$0xff] }
 0x118   :  { %2057 = vmatpush.bf16.msrb.mxu2 %v3344_v61 }
 0x11a   :  { %2066 = vmatpush.bf16.msrb.mxu3 %v3440_v26  ;;  %v3830_v26 = vld [vmem:[%s4172_s5 + $0x18] sm:$0xff] }
 0x11b   :  { %v1457_v6 = vpop.f32.mrf.mxu2 }
 0x11c   :  { %v1470_v10 = vpop.f32.mrf.mxu3  ;;  %2058 = vmatpush.bf16.msrb.mxu2 %v3336_v4 }
 0x11e   :  { %2067 = vmatpush.bf16.msrb.mxu3 %v3432_v31  ;;  %v3828_v31 = vld [vmem:[%s4172_s5 + $0x8] sm:$0xff] }
 0x120   :  { %2059 = vmatpush.bf16.msrb.mxu2 %v3328_v14  ;;  %v1650_v14 = vperm.slane %v1648_v13, 0 }
 0x122   :  { %2068 = vmatpush.bf16.msrb.mxu3 %v3424_v9  ;;  %v3836_v9 = vld [vmem:[%s4172_s5 + $0x48] sm:$0xff] }
 0x126   :  { %2069 = vmatpush.bf16.msrb.mxu3 %v3416_v47  ;;  %v3850_v47 = vld [vmem:[%s4174_s7 + $0x38] sm:$0xff] }
 0x12a   :  { %2070 = vmatpush.bf16.msrb.mxu3 %v3408_v51 }
 0x12b   :  { %v1481_v22 = vpop.f32.mrf.mxu0 }
 0x12c   :  { %v1482_v24 = vadd.f32 %v1481_v22, %v1469_v32  ;;  %v1494_v25 = vpop.f32.mrf.mxu1 }
 0x12e   :  { %v1495_v27 = vadd.f32 %v1494_v25, %v1482_v24  ;;  %2071 = vmatpush.bf16.msrb.mxu3 %v3400_v56  ;;  %v3832_v24 = vld [vmem:[%s4172_s5 + $0x28] sm:$0xff]  ;;  %v3831_v25 = vld [vmem:[%s4172_s5 + $0x20] sm:$0xff] }
 0x12f   :  { %2216 = vmatpush.bf16.msra.mxu0 %v3832_v24 }
 0x130   :  { %v1578_v30 = vmax.f32 %v1495_v27, 0.0  ;;  %v3842_v27 = vld [vmem:[%s4172_s5 + $0x78] sm:$0xff] }
 0x131   :  { %2227 = vmatpush.bf16.msra.mxu1 %v3842_v27 }
 0x132   :  { %v1582_v35 = vpack.c.bf16 %v1578_v30, %v1578_v30  ;;  %2072 = vmatpush.bf16.msrb.mxu3 %v3392_v59 }
 0x133   :  { %v1507_v38 = vpop.f32.mrf.mxu2  ;;  %v1483_v40 = vpop.f32.mrf.mxu0  ;;  %2217 = vmatpush.bf16.msra.mxu0 %v3831_v25  ;;  %v3866_v25 = vld [vmem:[%s4179_s12] ss:$0 sm:$0xff] }
 0x134   :  { %v1520_v39 = vpop.f32.mrf.mxu3  ;;  %2008 = vmatmul.bf16.vlgmr.msra.gmra.mxu2 %v1582_v35  ;;  %v1496_v45 = vpop.f32.mrf.mxu1  ;;  %v1508_v60 = vadd.f32 %v1507_v38, %v299_v34  ;;  %v3827_v38 = vld [vmem:[%s4172_s5] sm:$0xff] }
 0x135   :  { %2228 = vmatpush.bf16.msra.mxu1 %v3841_v28  ;;  %2310 = vmatpush.bf16.msra.mxu2 %v3850_v47 }
 0x136   :  { %v1521_v42 = vadd.f32 %v1520_v39, %v1508_v60  ;;  %v3839_v39 = vld [vmem:[%s4172_s5 + $0x60] sm:$0xff] }
 0x137   :  { %2218 = vmatpush.bf16.msra.mxu0 %v3830_v26 }
 0x139   :  { %2311 = vmatpush.bf16.msra.mxu2 %v3849_v48 }
 0x13b   :  { %v1509_v50 = vpop.f32.mrf.mxu2  ;;  %2219 = vmatpush.bf16.msra.mxu0 %v3829_v29 }
 0x13c   :  { %v1522_v52 = vpop.f32.mrf.mxu3 }
 0x13f   :  { %2220 = vmatpush.bf16.msra.mxu0 %v3828_v31 }
 0x143   :  { %2221 = vmatpush.bf16.msra.mxu0 %v3827_v38 }
 0x144   :  { %2060 = vmatmul.bf16.vlgmr.msrb.gmra.mxu2 %v1582_v35  ;;  %v3840_v35 = vld [vmem:[%s4172_s5 + $0x68] sm:$0xff] }
 0x145   :  { %2229 = vmatpush.bf16.msra.mxu1 %v3840_v35 }
 0x149   :  { %2230 = vmatpush.bf16.msra.mxu1 %v3839_v39 }
 0x14b   :  { %v1533_v61 = vpop.f32.mrf.mxu0 }
 0x14c   :  { %v1546_v62 = vpop.f32.mrf.mxu1  ;;  %v1534_v63 = vadd.f32 %v1533_v61, %v1521_v42  ;;  %v3848_v42 = vld [vmem:[%s4174_s7 + $0x28] sm:$0xff]  ;;  %v3847_v61 = vld [vmem:[%s4174_s7 + $0x20] sm:$0xff] }
 0x14d   :  { %2231 = vmatpush.bf16.msra.mxu1 %v3838_v43  ;;  %2312 = vmatpush.bf16.msra.mxu2 %v3848_v42 }
 0x14e   :  { %v1547_v0 = vadd.f32 %v1546_v62, %v1534_v63  ;;  %v3846_v62 = vld [vmem:[%s4174_s7 + $0x18] sm:$0xff]  ;;  %v3845_v63 = vld [vmem:[%s4174_s7 + $0x10] sm:$0xff] }
 0x151   :  { %2232 = vmatpush.bf16.msra.mxu1 %v3837_v44  ;;  %2313 = vmatpush.bf16.msra.mxu2 %v3847_v61 }
 0x153   :  { %v1559_v1 = vpop.f32.mrf.mxu2  ;;  %v1535_v4 = vpop.f32.mrf.mxu0 }
 0x154   :  { %v1560_v2 = vadd.f32 %v1559_v1, %v1547_v0  ;;  %v1572_v3 = vpop.f32.mrf.mxu3  ;;  %v1548_v5 = vpop.f32.mrf.mxu1  ;;  %v3844_v0 = vld [vmem:[%s4174_s7 + $0x8] sm:$0xff]  ;;  %v3843_v1 = vld [vmem:[%s4174_s7] sm:$0xff] }
 0x155   :  { %2233 = vmatpush.bf16.msra.mxu1 %v3836_v9  ;;  %2314 = vmatpush.bf16.msra.mxu2 %v3846_v62  ;;  %v3852_v4 = vld [vmem:[%s4176_s9 + $0x8] sm:$0xff] }
 0x156   :  { %v1573_v6 = vadd.f32 %v1572_v3, %v1560_v2  ;;  %v3854_v2 = vld [vmem:[%s4176_s9 + $0x18] sm:$0xff]  ;;  %v3853_v3 = vld [vmem:[%s4176_s9 + $0x10] sm:$0xff] }
 0x158   :  { %v1579_v7 = vmax.f32 %v1573_v6, 0.0 }
 0x159   :  { %2234 = vmatpush.bf16.msra.mxu1 %v3835_v37  ;;  %2315 = vmatpush.bf16.msra.mxu2 %v3845_v63 }
 0x15a   :  { %v1583_v8 = vpack.c.bf16 %v1579_v7, %v1579_v7  ;;  %v3863_v7 = vld [vmem:[%s4173_s6] ss:$0 sm:$0xff] }
 0x15b   :  { %v1561_v10 = vpop.f32.mrf.mxu2 }
 0x15c   :  { %v1574_v53 = vpop.f32.mrf.mxu3  ;;  %2021 = vmatmul.bf16.vlgmr.msra.gmra.mxu3 %v1583_v8 }
 0x15d   :  { %2316 = vmatpush.bf16.msra.mxu2 %v3844_v0  ;;  %2369 = vmatpush.bf16.msra.mxu3 %v3854_v2 }
 0x161   :  { %2317 = vmatpush.bf16.msra.mxu2 %v3843_v1  ;;  %2370 = vmatpush.bf16.msra.mxu3 %v3853_v3 }
 0x165   :  { %2371 = vmatpush.bf16.msra.mxu3 %v3852_v4 }
 0x16b   :  { %v1983_v11 = vpop.f32.mrf.mxu0 }
 0x16c   :  { %2073 = vmatmul.bf16.vlgmr.msrb.gmra.mxu3 %v1583_v8  ;;  %v1984_v33 = vadd.f32 %v1983_v11, %v1650_v14  ;;  %v3851_v14 = vld [vmem:[%s4176_s9] sm:$0xff] }
 0x16d   :  { %2372 = vmatpush.bf16.msra.mxu3 %v3851_v14 }
 0x173   :  { %v1985_v12 = vpop.f32.mrf.mxu0 }
 0x17a   :  { %v1996_v15 = vpop.f32.mrf.mxu1 }
 0x17b   :  { %v1997_v16 = vadd.f32 %v1996_v15, %v1984_v33  ;;  %v3856_v33 = vld [vmem:[%s4178_s11 + $0x8] sm:$0xff]  ;;  %v3855_v15 = vld [vmem:[%s4178_s11] sm:$0xff] }
 0x17c   :  { %2410 = vmatpush.bf16.msrb.mxu3 %v3856_v33 }
 0x180   :  { %2411 = vmatpush.bf16.msrb.mxu3 %v3855_v15 }
 0x182   :  { %v1998_v18 = vpop.f32.mrf.mxu1 }
 0x18b   :  { %v2035_v17 = vpop.f32.mrf.mxu0 }
 0x18c   :  { %v2036_v41 = vadd.f32 %v2035_v17, %v1651_v19  ;;  %v2048_v32 = vpop.f32.mrf.mxu1 }
 0x18e   :  { %v2049_v21 = vadd.f32 %v2048_v32, %v2036_v41  ;;  %v3865_v32 = vld [vmem:[%s4177_s10] ss:$0 sm:$0xff] }
 0x193   :  { %v2037_v20 = vpop.f32.mrf.mxu0 }
 0x194   :  { %v2050_v22 = vpop.f32.mrf.mxu1 }
 0x1b7   :  { %v2009_v30 = vpop.f32.mrf.mxu2 }
 0x1b8   :  { %v2010_v49 = vadd.f32 %v2009_v30, %v1997_v16  ;;  %v3864_v16 = vld [vmem:[%s4175_s8] ss:$0 sm:$0xff] }
 0x1bf   :  { %v2011_v40 = vpop.f32.mrf.mxu2 }
 0x1c7   :  { %v2061_v45 = vpop.f32.mrf.mxu2 }
 0x1c8   :  { %v2062_v56 = vadd.f32 %v2061_v45, %v2049_v21 }
 0x1cf   :  { %v2063_v46 = vpop.f32.mrf.mxu2 }
 0x1df   :  { %v2022_v50 = vpop.f32.mrf.mxu3 }
 0x1e0   :  { %v2023_v51 = vadd.f32 %v2022_v50, %v2010_v49 }
 0x1e2   :  { %v2078_v52 = vmax.f32 %v2023_v51, 0.0 }
 0x1e4   :  { %v2080_v54 = vpack.c.bf16 %v2078_v52, %v2078_v52 }
 0x1e6   :  { %2222 = vmatmul.bf16.vlgmr.msra.gmra.mxu0 %v2080_v54 }
 0x1e7   :  { %v2024_v55 = vpop.f32.mrf.mxu3 }
 0x1ef   :  { %v2074_v57 = vpop.f32.mrf.mxu3 }
 0x1f0   :  { %v2075_v58 = vadd.f32 %v2074_v57, %v2062_v56 }
 0x1f2   :  { %v2079_v34 = vmax.f32 %v2075_v58, 0.0 }
 0x1f4   :  { %v2081_v59 = vpack.c.bf16 %v2079_v34, %v2079_v34 }
 0x1f6   :  { %2235 = vmatmul.bf16.vlgmr.msra.gmra.mxu1 %v2081_v59 }
 0x1f7   :  { %v2076_v60 = vpop.f32.mrf.mxu3 }
 0x263   :  { %v2223_v5 = vpop.f32.mrf.mxu0 }
 0x264   :  { %v2224_v8 = vadd.f32 %v3863_v7, %v2223_v5 }
 0x26b   :  { %v2225_v6 = vpop.f32.mrf.mxu0 }
 0x273   :  { %v2236_v10 = vpop.f32.mrf.mxu1 }
 0x274   :  { %v2237_v53 = vadd.f32 %v2236_v10, %v2224_v8 }
 0x276   :  { %v2240_v11 = vmax.f32 %v2237_v53, 0.0 }
 0x278   :  { %v2241_v12 = vpack.c.bf16 %v2240_v11, %v2240_v11 }
 0x27a   :  { %2318 = vmatmul.bf16.vlgmr.msra.gmra.mxu2 %v2241_v12 }
 0x27b   :  { %v2238_v13 = vpop.f32.mrf.mxu1 }
 0x2fd   :  { %v2319_v17 = vpop.f32.mrf.mxu2 }
 0x2fe   :  { %v2320_v18 = vadd.f32 %v3864_v16, %v2319_v17 }
 0x300   :  { %v2323_v19 = vmax.f32 %v2320_v18, 0.0 }
 0x302   :  { %v2324_v41 = vpack.c.bf16 %v2323_v19, %v2323_v19 }
 0x304   :  { %3561 = vmatmul.msk.bf16.vlgmr.msra.gmra.mxu3 %vm2361_vm0, %v2324_v41 }
 0x305   :  { %v2321_v20 = vpop.f32.mrf.mxu2 }
 0x387   :  { %v2374_v21 = vpop.f32.mrf.mxu3 }
 0x388   :  { %v2375_v22 = vadd.f32 %v3865_v32, %v2374_v21 }
 0x38a   :  { %v2378_v36 = vmax.f32 %v2375_v22, 0.0 }
 0x38c   :  { %v2379_v23 = vpack.c.bf16 %v2378_v36, %v2378_v36 }
 0x38e   :  { %3570 = vmatmul.msk.bf16.vlgmr.msrb.gmra.mxu3 %vm2400_vm1, %v2379_v23 }
 0x38f   :  { %v2376_v24 = vpop.f32.mrf.mxu3 }
 0x411   :  { %v2413_v26 = vpop.f32.mrf.mxu3 }
 0x412   :  { %v2414_v27 = vadd.f32 %v3866_v25, %v2413_v26 }
 0x414   :  { %2418 = vst.msk [vmem:[%s4180_s13] sm:$0x3] %vm2417_vm2, %v2414_v27 }
 0x419   :  { %v2415_v28 = vpop.f32.mrf.mxu3 }
 0x41a   :  { %2423 = vsyncpa [#allocation3], 1 }
 0x41b   :  { %2424 = vsyncpa [#allocation5], 1 }

</bundles_post_ra>
